<compile_context>
chip_gen: v5e
topology: v5e:2x2
jax: 0.10.0
libtpu: 0.0.40
codegen_flags: <defaults>
</compile_context>

<pallas_src>
import math

import jax
import jax.numpy as jnp
from jax import lax
from jax.experimental import pallas as pl
from jax.experimental.pallas import tpu as pltpu

d_Q = 64
d_V = 64
d_model = 256
n_head = 1
d_ff = 256
LN_EPS = 1e-5  # torch.nn.LayerNorm default


def _layer_norm(y):
    # LayerNorm(d_model) with default (fresh) params: weight=1, bias=0.
    mean = jnp.mean(y, axis=-1, keepdims=True)
    var = jnp.mean(jnp.square(y - mean), axis=-1, keepdims=True)
    return (y - mean) * lax.rsqrt(var + jnp.float32(LN_EPS))


def _decoder_layer_kernel(dec_ref, enc_ref, smask_ref, xmask_ref,
                          w_qkv1_ref, w_fc1_ref,
                          w_q2_ref, w_kv2_ref, w_fc2_ref,
                          w_ff1_ref, w_ff2_ref,
                          out_ref):
    Bt, Sd, D = dec_ref.shape
    _, Se, _ = enc_ref.shape

    dec = dec_ref[...]                                   # (Bt, Sd, D) f32
    enc = enc_ref[...]                                   # (Bt, Se, D) f32
    # int8 masks -> widen in-register; nonzero = masked.
    smask = smask_ref[...].astype(jnp.int32) != 0        # (Bt, Sd, Sd)
    xmask = xmask_ref[...].astype(jnp.int32) != 0        # (Bt, Sd, Se)

    scale = jnp.float32(1.0 / math.sqrt(d_Q))

    def masked_softmax(score, mask):
        # Mask applied once, after exp(): masked terms contribute exactly 0 to the
        # denominator, equivalent to torch's -1e9 fill + post-softmax zero fill
        # (rows are never fully masked).
        m = jnp.max(score, axis=-1, keepdims=True)
        e = jnp.exp(score - m)
        e = jnp.where(mask, jnp.float32(0.0), e)
        denom = jnp.sum(e, axis=-1, keepdims=True)
        return e * pl.reciprocal(denom, approx=True)

    def attend(q, k, v, mask):
        # q: (Bt, Sq, d_Q), k/v: (Bt, Sk, d_Q) f32 -> (Bt, Sq, d_V) f32
        # TODO(synk): for long sequences (S >~ 1k, esp. v7x's 64 MiB VMEM) tile this
        # over KV blocks flash-style instead of materializing the (Sq, Sk) score.
        score = jnp.einsum("bqd,bkd->bqk",
                           q.astype(jnp.bfloat16), k.astype(jnp.bfloat16),
                           preferred_element_type=jnp.float32) * scale
        attn = masked_softmax(score, mask)
        return jnp.einsum("bqk,bkd->bqd",
                          attn.astype(jnp.bfloat16), v.astype(jnp.bfloat16),
                          preferred_element_type=jnp.float32)

    # ---- sublayer 1: masked self-attention + residual + LayerNorm -----------
    dec2d = dec.reshape(Bt * Sd, D).astype(jnp.bfloat16)
    qkv = jnp.dot(dec2d, w_qkv1_ref[...],
                  preferred_element_type=jnp.float32)     # (Bt*Sd, 3*d_Q)
    q1 = qkv[:, 0 * d_Q:1 * d_Q].reshape(Bt, Sd, d_Q)
    k1 = qkv[:, 1 * d_Q:2 * d_Q].reshape(Bt, Sd, d_Q)
    v1 = qkv[:, 2 * d_Q:3 * d_Q].reshape(Bt, Sd, d_V)
    ctx1 = attend(q1, k1, v1, smask).reshape(Bt * Sd, d_V)
    o1 = jnp.dot(ctx1.astype(jnp.bfloat16), w_fc1_ref[...],
                 preferred_element_type=jnp.float32).reshape(Bt, Sd, D)
    h1 = _layer_norm(o1 + dec)

    # ---- sublayer 2: encoder/decoder cross-attention + residual + LN --------
    h1_2d = h1.reshape(Bt * Sd, D).astype(jnp.bfloat16)
    enc2d = enc.reshape(Bt * Se, D).astype(jnp.bfloat16)
    q2 = jnp.dot(h1_2d, w_q2_ref[...],
                 preferred_element_type=jnp.float32).reshape(Bt, Sd, d_Q)
    kv2 = jnp.dot(enc2d, w_kv2_ref[...],
                  preferred_element_type=jnp.float32)     # (Bt*Se, 2*d_Q)
    k2 = kv2[:, :d_Q].reshape(Bt, Se, d_Q)
    v2 = kv2[:, d_Q:].reshape(Bt, Se, d_V)
    ctx2 = attend(q2, k2, v2, xmask).reshape(Bt * Sd, d_V)
    o2 = jnp.dot(ctx2.astype(jnp.bfloat16), w_fc2_ref[...],
                 preferred_element_type=jnp.float32).reshape(Bt, Sd, D)
    h2 = _layer_norm(o2 + h1)

    # ---- sublayer 3: position-wise FFN + residual + LayerNorm ---------------
    h2_2d = h2.reshape(Bt * Sd, D)
    f1 = jnp.dot(h2_2d.astype(jnp.bfloat16), w_ff1_ref[...],
                 preferred_element_type=jnp.float32)       # (Bt*Sd, d_ff)
    f1 = jnp.maximum(f1, jnp.float32(0.0))                 # ReLU
    f2 = jnp.dot(f1.astype(jnp.bfloat16), w_ff2_ref[...],
                 preferred_element_type=jnp.float32).reshape(Bt, Sd, D)
    out = _layer_norm(f2 + h2)

    out_ref[...] = out.astype(out_ref.dtype)


def decoder_layer(dec_embedding, enc_embedding,
                  dec_self_attn_mask, dec_enc_attn_mask,
                  params, *, batch_tile=None):
    """dec_embedding: (B, Sd, d_model) f32; enc_embedding: (B, Se, d_model) f32;
    masks: (B, Sd, Sd) / (B, Sd, Se) int8 (nonzero = masked);
    params: dict of f32 weights stored as (in, out). Returns (B, Sd, d_model) f32."""
    B, Sd, D = dec_embedding.shape
    _, Se, _ = enc_embedding.shape
    assert D == d_model

    # Collapse the grid for tiny batches (one step, no per-step overhead). For large
    # B, pass batch_tile = B // (2*k) so the "parallel" axis has >= 2 steps and
    # shards across v7x's two TensorCores.
    if batch_tile is None:
        batch_tile = B
    assert B % batch_tile == 0
    grid = (B // batch_tile,)

    bf16 = jnp.bfloat16
    # Fused QKV (self-attn) and KV (cross-attn) weights; cast once to bf16 here.
    w_qkv1 = jnp.concatenate(
        [params["w_q1"], params["w_k1"], params["w_v1"]], axis=1).astype(bf16)  # (D, 3*d_Q)
    w_fc1 = params["w_fc1"].astype(bf16)                                        # (d_V, D)
    w_q2 = params["w_q2"].astype(bf16)                                          # (D, d_Q)
    w_kv2 = jnp.concatenate(
        [params["w_k2"], params["w_v2"]], axis=1).astype(bf16)                  # (D, 2*d_Q)
    w_fc2 = params["w_fc2"].astype(bf16)                                        # (d_V, D)
    w_ff1 = params["w_ff1"].astype(bf16)                                        # (D, d_ff)
    w_ff2 = params["w_ff2"].astype(bf16)                                        # (d_ff, D)

    dec_spec = pl.BlockSpec((batch_tile, Sd, D), lambda b: (b, 0, 0))
    enc_spec = pl.BlockSpec((batch_tile, Se, D), lambda b: (b, 0, 0))
    smask_spec = pl.BlockSpec((batch_tile, Sd, Sd), lambda b: (b, 0, 0))
    xmask_spec = pl.BlockSpec((batch_tile, Sd, Se), lambda b: (b, 0, 0))

    def _wspec(w):
        return pl.BlockSpec(w.shape, lambda b: (0, 0))

    return pl.pallas_call(
        _decoder_layer_kernel,
        out_shape=jax.ShapeDtypeStruct((B, Sd, D), jnp.float32),
        grid_spec=pltpu.PrefetchScalarGridSpec(
            num_scalar_prefetch=0,
            grid=grid,
            in_specs=[dec_spec, enc_spec, smask_spec, xmask_spec,
                      _wspec(w_qkv1), _wspec(w_fc1),
                      _wspec(w_q2), _wspec(w_kv2), _wspec(w_fc2),
                      _wspec(w_ff1), _wspec(w_ff2)],
            out_specs=dec_spec,
        ),
        compiler_params=pltpu.CompilerParams(
            dimension_semantics=("parallel",)),
    )(dec_embedding, enc_embedding, dec_self_attn_mask, dec_enc_attn_mask,
      w_qkv1, w_fc1, w_q2, w_kv2, w_fc2, w_ff1, w_ff2)


def _init_linear(key, fan_in, fan_out):
    # nn.Linear default init U(-1/sqrt(in), 1/sqrt(in)); stored pre-transposed (in, out).
    bound = 1.0 / math.sqrt(fan_in)
    return jax.random.uniform(key, (fan_in, fan_out), dtype=jnp.float32,
                              minval=-bound, maxval=bound)


if __name__ == "__main__":
    B, S_dec, S_enc = 2, 8, 16

    key = jax.random.PRNGKey(0)
    (k_q1, k_k1, k_v1, k_f1,
     k_q2, k_k2, k_v2, k_f2,
     k_ff1, k_ff2, k_dec, k_enc, k_xm) = jax.random.split(key, 13)

    params = dict(
        w_q1=_init_linear(k_q1, d_model, d_Q * n_head),
        w_k1=_init_linear(k_k1, d_model, d_Q * n_head),
        w_v1=_init_linear(k_v1, d_model, d_V * n_head),
        w_fc1=_init_linear(k_f1, d_V * n_head, d_model),
        w_q2=_init_linear(k_q2, d_model, d_Q * n_head),
        w_k2=_init_linear(k_k2, d_model, d_Q * n_head),
        w_v2=_init_linear(k_v2, d_model, d_V * n_head),
        w_fc2=_init_linear(k_f2, d_V * n_head, d_model),
        w_ff1=_init_linear(k_ff1, d_model, d_ff),
        w_ff2=_init_linear(k_ff2, d_ff, d_model),
    )

    dec_embedding = jax.random.normal(k_dec, (B, S_dec, d_model), dtype=jnp.float32)
    enc_embedding = jax.random.normal(k_enc, (B, S_enc, d_model), dtype=jnp.float32)

    # Decoder self-attention mask: causal (no row fully masked), shipped as int8.
    causal = jnp.triu(jnp.ones((S_dec, S_dec), dtype=jnp.int8), k=1)
    dec_self_attn_mask = jnp.broadcast_to(causal, (B, S_dec, S_dec)).astype(jnp.int8)
    # Encoder/decoder mask: random padding-style mask, column 0 never masked.
    dec_enc_attn_mask = jax.random.uniform(k_xm, (B, S_dec, S_enc)) < 0.25
    dec_enc_attn_mask = dec_enc_attn_mask.at[:, :, 0].set(False).astype(jnp.int8)

    out = decoder_layer(dec_embedding, enc_embedding,
                        dec_self_attn_mask, dec_enc_attn_mask, params)
    jax.block_until_ready(out)

    # ---- pure-JAX f32 reference implementing the exact torch forward --------
    def ref_ln(y):
        mean = jnp.mean(y, axis=-1, keepdims=True)
        var = jnp.mean((y - mean) ** 2, axis=-1, keepdims=True)
        return (y - mean) / jnp.sqrt(var + LN_EPS)

    def ref_mha(iq, ik, iv, mask, wq, wk, wv, wfc):
        Q = iq @ wq
        K = ik @ wk
        V = iv @ wv
        score = jnp.einsum("bqd,bkd->bqk", Q, K) / jnp.sqrt(jnp.float32(d_Q))
        score = jnp.where(mask != 0, jnp.float32(-1e9), score)
        attn = jax.nn.softmax(score, axis=-1)
        attn = jnp.where(mask != 0, jnp.float32(0.0), attn)
        ctx = jnp.einsum("bqk,bkd->bqd", attn, V)
        return ref_ln(ctx @ wfc + iq)

    h1 = ref_mha(dec_embedding, dec_embedding, dec_embedding, dec_self_attn_mask,
                 params["w_q1"], params["w_k1"], params["w_v1"], params["w_fc1"])
    h2 = ref_mha(h1, enc_embedding, enc_embedding, dec_enc_attn_mask,
                 params["w_q2"], params["w_k2"], params["w_v2"], params["w_fc2"])
    ffn = jnp.maximum(h2 @ params["w_ff1"], 0.0) @ params["w_ff2"]
    ref_out = ref_ln(ffn + h2)

    # bf16 MXU operands + approx softmax reciprocal in the kernel vs. pure-f32
    # reference: compare at the ~1e-2 level.
    err = jnp.max(jnp.abs(out - ref_out))
    assert err < 2e-2, f"mismatch vs reference: max abs err = {err}"

    print("KERNEL_OK")
</pallas_src>

<mosaic_0001>
module attributes {stable_mosaic.version = 11 : i64} {
  func.func @_decoder_layer_kernel(%arg0: i32, %arg1: memref<2x8x256xf32, #tpu.memory_space<vmem>>, %arg2: memref<2x16x256xf32, #tpu.memory_space<vmem>>, %arg3: memref<2x8x8xi8, #tpu.memory_space<vmem>>, %arg4: memref<2x8x16xi8, #tpu.memory_space<vmem>>, %arg5: memref<256x192xbf16, #tpu.memory_space<vmem>>, %arg6: memref<64x256xbf16, #tpu.memory_space<vmem>>, %arg7: memref<256x64xbf16, #tpu.memory_space<vmem>>, %arg8: memref<256x128xbf16, #tpu.memory_space<vmem>>, %arg9: memref<64x256xbf16, #tpu.memory_space<vmem>>, %arg10: memref<256x256xbf16, #tpu.memory_space<vmem>>, %arg11: memref<256x256xbf16, #tpu.memory_space<vmem>>, %arg12: memref<2x8x256xf32, #tpu.memory_space<vmem>>) attributes {dimension_semantics = [#tpu.dimension_semantics<parallel>], iteration_bounds = array<i64: 1>, scalar_prefetch = 0 : i64, scratch_operands = 0 : i64, tpu.core_type = #tpu.core_type<tc>, window_params = [{transform_indices = @transform_0, window_bounds = array<i64: 2, 8, 256>}, {transform_indices = @transform_1, window_bounds = array<i64: 2, 16, 256>}, {transform_indices = @transform_2, window_bounds = array<i64: 2, 8, 8>}, {transform_indices = @transform_3, window_bounds = array<i64: 2, 8, 16>}, {pipeline_mode = #tpu.pipeline_mode<synchronous>, transform_indices = @transform_4, window_bounds = array<i64: 256, 192>}, {pipeline_mode = #tpu.pipeline_mode<synchronous>, transform_indices = @transform_5, window_bounds = array<i64: 64, 256>}, {pipeline_mode = #tpu.pipeline_mode<synchronous>, transform_indices = @transform_6, window_bounds = array<i64: 256, 64>}, {pipeline_mode = #tpu.pipeline_mode<synchronous>, transform_indices = @transform_7, window_bounds = array<i64: 256, 128>}, {pipeline_mode = #tpu.pipeline_mode<synchronous>, transform_indices = @transform_8, window_bounds = array<i64: 64, 256>}, {pipeline_mode = #tpu.pipeline_mode<synchronous>, transform_indices = @transform_9, window_bounds = array<i64: 256, 256>}, {pipeline_mode = #tpu.pipeline_mode<synchronous>, transform_indices = @transform_10, window_bounds = array<i64: 256, 256>}, {transform_indices = @transform_11, window_bounds = array<i64: 2, 8, 256>}]} {
    %c0 = arith.constant 0 : index
    %c0_0 = arith.constant 0 : index
    %c0_1 = arith.constant 0 : index
    %0 = vector.load %arg1[%c0, %c0_0, %c0_1] : memref<2x8x256xf32, #tpu.memory_space<vmem>>, vector<2x8x256xf32>
    %c0_2 = arith.constant 0 : index
    %c0_3 = arith.constant 0 : index
    %c0_4 = arith.constant 0 : index
    %1 = vector.load %arg2[%c0_2, %c0_3, %c0_4] : memref<2x16x256xf32, #tpu.memory_space<vmem>>, vector<2x16x256xf32>
    %c0_5 = arith.constant 0 : index
    %c0_6 = arith.constant 0 : index
    %c0_7 = arith.constant 0 : index
    %2 = vector.load %arg3[%c0_5, %c0_6, %c0_7] : memref<2x8x8xi8, #tpu.memory_space<vmem>>, vector<2x8x8xi8>
    %3 = arith.extsi %2 : vector<2x8x8xi8> to vector<2x8x8xi32>
    %c0_i32 = arith.constant 0 : i32
    %4 = vector.broadcast %c0_i32 : i32 to vector<2x8x8xi32>
    %5 = arith.cmpi ne, %3, %4 : vector<2x8x8xi32>
    %c0_8 = arith.constant 0 : index
    %c0_9 = arith.constant 0 : index
    %c0_10 = arith.constant 0 : index
    %6 = vector.load %arg4[%c0_8, %c0_9, %c0_10] : memref<2x8x16xi8, #tpu.memory_space<vmem>>, vector<2x8x16xi8>
    %7 = arith.extsi %6 : vector<2x8x16xi8> to vector<2x8x16xi32>
    %c0_i32_11 = arith.constant 0 : i32
    %8 = vector.broadcast %c0_i32_11 : i32 to vector<2x8x16xi32>
    %9 = arith.cmpi ne, %7, %8 : vector<2x8x16xi32>
    %10 = vector.shape_cast %0 : vector<2x8x256xf32> to vector<16x256xf32>
    %11 = arith.truncf %10 : vector<16x256xf32> to vector<16x256xbf16>
    %c0_12 = arith.constant 0 : index
    %c0_13 = arith.constant 0 : index
    %12 = vector.load %arg5[%c0_12, %c0_13] : memref<256x192xbf16, #tpu.memory_space<vmem>>, vector<256x192xbf16>
    %cst = arith.constant dense<0.000000e+00> : vector<16x192xf32>
    %13 = tpu.matmul %11, %12, %cst {dimension_numbers = #tpu.dot_dimension_numbers<[1], [0], [0], [1], [0, 0, 1, 1], [], []>} : vector<16x256xbf16>, vector<256x192xbf16>, vector<16x192xf32> -> vector<16x192xf32>
    %14 = vector.extract_strided_slice %13 {offsets = [0, 0], sizes = [16, 64], strides = [1, 1]} : vector<16x192xf32> to vector<16x64xf32>
    %15 = vector.shape_cast %14 : vector<16x64xf32> to vector<2x8x64xf32>
    %16 = vector.extract_strided_slice %13 {offsets = [0, 64], sizes = [16, 64], strides = [1, 1]} : vector<16x192xf32> to vector<16x64xf32>
    %17 = vector.shape_cast %16 : vector<16x64xf32> to vector<2x8x64xf32>
    %18 = vector.extract_strided_slice %13 {offsets = [0, 128], sizes = [16, 64], strides = [1, 1]} : vector<16x192xf32> to vector<16x64xf32>
    %19 = vector.shape_cast %18 : vector<16x64xf32> to vector<2x8x64xf32>
    %20 = arith.truncf %15 : vector<2x8x64xf32> to vector<2x8x64xbf16>
    %21 = arith.truncf %17 : vector<2x8x64xf32> to vector<2x8x64xbf16>
    "tpu.trace_start"() <{level = 10 : i32, message = "bqd,bkd->bqk"}> : () -> ()
    %cst_14 = arith.constant dense<0.000000e+00> : vector<2x8x8xf32>
    %22 = tpu.matmul %20, %21, %cst_14 {dimension_numbers = #tpu.dot_dimension_numbers<[2], [2], [1], [1], [0, 0, 0, 1, 1, 1], [0], [0]>} : vector<2x8x64xbf16>, vector<2x8x64xbf16>, vector<2x8x8xf32> -> vector<2x8x8xf32>
    "tpu.trace_stop"() : () -> ()
    %cst_15 = arith.constant 1.250000e-01 : f32
    %23 = vector.broadcast %cst_15 : f32 to vector<2x8x8xf32>
    %24 = arith.mulf %22, %23 : vector<2x8x8xf32>
    %cst_16 = arith.constant dense<0xFF800000> : vector<2x8xf32>
    %25 = vector.multi_reduction <maximumf>, %24, %cst_16 [2] : vector<2x8x8xf32> to vector<2x8xf32>
    %26 = vector.shape_cast %25 : vector<2x8xf32> to vector<2x8x1xf32>
    %27 = vector.broadcast %26 : vector<2x8x1xf32> to vector<2x8x8xf32>
    %28 = arith.subf %24, %27 : vector<2x8x8xf32>
    %29 = math.exp %28 : vector<2x8x8xf32>
    %cst_17 = arith.constant 0.000000e+00 : f32
    %30 = vector.broadcast %cst_17 : f32 to vector<2x8x8xf32>
    %31 = arith.select %5, %30, %29 : vector<2x8x8xi1>, vector<2x8x8xf32>
    %cst_18 = arith.constant dense<0.000000e+00> : vector<2x8xf32>
    %32 = vector.multi_reduction <add>, %31, %cst_18 [2] : vector<2x8x8xf32> to vector<2x8xf32>
    %33 = vector.shape_cast %32 : vector<2x8xf32> to vector<2x8x1xf32>
    %34 = tpu.reciprocal %33 {approx = true} : vector<2x8x1xf32> -> vector<2x8x1xf32>
    %35 = vector.broadcast %34 : vector<2x8x1xf32> to vector<2x8x8xf32>
    %36 = arith.mulf %31, %35 : vector<2x8x8xf32>
    %37 = arith.truncf %36 : vector<2x8x8xf32> to vector<2x8x8xbf16>
    %38 = arith.truncf %19 : vector<2x8x64xf32> to vector<2x8x64xbf16>
    "tpu.trace_start"() <{level = 10 : i32, message = "bqk,bkd->bqd"}> : () -> ()
    %cst_19 = arith.constant dense<0.000000e+00> : vector<2x8x64xf32>
    %39 = tpu.matmul %37, %38, %cst_19 {dimension_numbers = #tpu.dot_dimension_numbers<[2], [1], [1], [2], [0, 0, 0, 1, 1, 2], [0], [0]>} : vector<2x8x8xbf16>, vector<2x8x64xbf16>, vector<2x8x64xf32> -> vector<2x8x64xf32>
    "tpu.trace_stop"() : () -> ()
    %40 = vector.shape_cast %39 : vector<2x8x64xf32> to vector<16x64xf32>
    %41 = arith.truncf %40 : vector<16x64xf32> to vector<16x64xbf16>
    %c0_20 = arith.constant 0 : index
    %c0_21 = arith.constant 0 : index
    %42 = vector.load %arg6[%c0_20, %c0_21] : memref<64x256xbf16, #tpu.memory_space<vmem>>, vector<64x256xbf16>
    %cst_22 = arith.constant dense<0.000000e+00> : vector<16x256xf32>
    %43 = tpu.matmul %41, %42, %cst_22 {dimension_numbers = #tpu.dot_dimension_numbers<[1], [0], [0], [1], [0, 0, 1, 1], [], []>} : vector<16x64xbf16>, vector<64x256xbf16>, vector<16x256xf32> -> vector<16x256xf32>
    %44 = vector.shape_cast %43 : vector<16x256xf32> to vector<2x8x256xf32>
    %45 = arith.addf %44, %0 : vector<2x8x256xf32>
    %cst_23 = arith.constant dense<0.000000e+00> : vector<2x8xf32>
    %46 = vector.multi_reduction <add>, %45, %cst_23 [2] : vector<2x8x256xf32> to vector<2x8xf32>
    %47 = vector.shape_cast %46 : vector<2x8xf32> to vector<2x8x1xf32>
    %cst_24 = arith.constant 2.560000e+02 : f32
    %48 = vector.broadcast %cst_24 : f32 to vector<2x8x1xf32>
    %49 = arith.divf %47, %48 : vector<2x8x1xf32>
    %50 = vector.broadcast %49 : vector<2x8x1xf32> to vector<2x8x256xf32>
    %51 = arith.subf %45, %50 : vector<2x8x256xf32>
    %52 = arith.mulf %51, %51 : vector<2x8x256xf32>
    %cst_25 = arith.constant dense<0.000000e+00> : vector<2x8xf32>
    %53 = vector.multi_reduction <add>, %52, %cst_25 [2] : vector<2x8x256xf32> to vector<2x8xf32>
    %54 = vector.shape_cast %53 : vector<2x8xf32> to vector<2x8x1xf32>
    %cst_26 = arith.constant 2.560000e+02 : f32
    %55 = vector.broadcast %cst_26 : f32 to vector<2x8x1xf32>
    %56 = arith.divf %54, %55 : vector<2x8x1xf32>
    %57 = vector.broadcast %49 : vector<2x8x1xf32> to vector<2x8x256xf32>
    %58 = arith.subf %45, %57 : vector<2x8x256xf32>
    %cst_27 = arith.constant 9.99999974E-6 : f32
    %59 = vector.broadcast %cst_27 : f32 to vector<2x8x1xf32>
    %60 = arith.addf %56, %59 : vector<2x8x1xf32>
    %61 = math.rsqrt %60 : vector<2x8x1xf32>
    %62 = vector.broadcast %61 : vector<2x8x1xf32> to vector<2x8x256xf32>
    %63 = arith.mulf %58, %62 : vector<2x8x256xf32>
    %64 = vector.shape_cast %63 : vector<2x8x256xf32> to vector<16x256xf32>
    %65 = arith.truncf %64 : vector<16x256xf32> to vector<16x256xbf16>
    %66 = vector.shape_cast %1 : vector<2x16x256xf32> to vector<32x256xf32>
    %67 = arith.truncf %66 : vector<32x256xf32> to vector<32x256xbf16>
    %c0_28 = arith.constant 0 : index
    %c0_29 = arith.constant 0 : index
    %68 = vector.load %arg7[%c0_28, %c0_29] : memref<256x64xbf16, #tpu.memory_space<vmem>>, vector<256x64xbf16>
    %cst_30 = arith.constant dense<0.000000e+00> : vector<16x64xf32>
    %69 = tpu.matmul %65, %68, %cst_30 {dimension_numbers = #tpu.dot_dimension_numbers<[1], [0], [0], [1], [0, 0, 1, 1], [], []>} : vector<16x256xbf16>, vector<256x64xbf16>, vector<16x64xf32> -> vector<16x64xf32>
    %70 = vector.shape_cast %69 : vector<16x64xf32> to vector<2x8x64xf32>
    %c0_31 = arith.constant 0 : index
    %c0_32 = arith.constant 0 : index
    %71 = vector.load %arg8[%c0_31, %c0_32] : memref<256x128xbf16, #tpu.memory_space<vmem>>, vector<256x128xbf16>
    %cst_33 = arith.constant dense<0.000000e+00> : vector<32x128xf32>
    %72 = tpu.matmul %67, %71, %cst_33 {dimension_numbers = #tpu.dot_dimension_numbers<[1], [0], [0], [1], [0, 0, 1, 1], [], []>} : vector<32x256xbf16>, vector<256x128xbf16>, vector<32x128xf32> -> vector<32x128xf32>
    %73 = vector.extract_strided_slice %72 {offsets = [0, 0], sizes = [32, 64], strides = [1, 1]} : vector<32x128xf32> to vector<32x64xf32>
    %74 = vector.shape_cast %73 : vector<32x64xf32> to vector<2x16x64xf32>
    %75 = vector.extract_strided_slice %72 {offsets = [0, 64], sizes = [32, 64], strides = [1, 1]} : vector<32x128xf32> to vector<32x64xf32>
    %76 = vector.shape_cast %75 : vector<32x64xf32> to vector<2x16x64xf32>
    %77 = arith.truncf %70 : vector<2x8x64xf32> to vector<2x8x64xbf16>
    %78 = arith.truncf %74 : vector<2x16x64xf32> to vector<2x16x64xbf16>
    "tpu.trace_start"() <{level = 10 : i32, message = "bqd,bkd->bqk"}> : () -> ()
    %cst_34 = arith.constant dense<0.000000e+00> : vector<2x8x16xf32>
    %79 = tpu.matmul %77, %78, %cst_34 {dimension_numbers = #tpu.dot_dimension_numbers<[2], [2], [1], [1], [0, 0, 0, 1, 1, 1], [0], [0]>} : vector<2x8x64xbf16>, vector<2x16x64xbf16>, vector<2x8x16xf32> -> vector<2x8x16xf32>
    "tpu.trace_stop"() : () -> ()
    %cst_35 = arith.constant 1.250000e-01 : f32
    %80 = vector.broadcast %cst_35 : f32 to vector<2x8x16xf32>
    %81 = arith.mulf %79, %80 : vector<2x8x16xf32>
    %cst_36 = arith.constant dense<0xFF800000> : vector<2x8xf32>
    %82 = vector.multi_reduction <maximumf>, %81, %cst_36 [2] : vector<2x8x16xf32> to vector<2x8xf32>
    %83 = vector.shape_cast %82 : vector<2x8xf32> to vector<2x8x1xf32>
    %84 = vector.broadcast %83 : vector<2x8x1xf32> to vector<2x8x16xf32>
    %85 = arith.subf %81, %84 : vector<2x8x16xf32>
    %86 = math.exp %85 : vector<2x8x16xf32>
    %cst_37 = arith.constant 0.000000e+00 : f32
    %87 = vector.broadcast %cst_37 : f32 to vector<2x8x16xf32>
    %88 = arith.select %9, %87, %86 : vector<2x8x16xi1>, vector<2x8x16xf32>
    %cst_38 = arith.constant dense<0.000000e+00> : vector<2x8xf32>
    %89 = vector.multi_reduction <add>, %88, %cst_38 [2] : vector<2x8x16xf32> to vector<2x8xf32>
    %90 = vector.shape_cast %89 : vector<2x8xf32> to vector<2x8x1xf32>
    %91 = tpu.reciprocal %90 {approx = true} : vector<2x8x1xf32> -> vector<2x8x1xf32>
    %92 = vector.broadcast %91 : vector<2x8x1xf32> to vector<2x8x16xf32>
    %93 = arith.mulf %88, %92 : vector<2x8x16xf32>
    %94 = arith.truncf %93 : vector<2x8x16xf32> to vector<2x8x16xbf16>
    %95 = arith.truncf %76 : vector<2x16x64xf32> to vector<2x16x64xbf16>
    "tpu.trace_start"() <{level = 10 : i32, message = "bqk,bkd->bqd"}> : () -> ()
    %cst_39 = arith.constant dense<0.000000e+00> : vector<2x8x64xf32>
    %96 = tpu.matmul %94, %95, %cst_39 {dimension_numbers = #tpu.dot_dimension_numbers<[2], [1], [1], [2], [0, 0, 0, 1, 1, 2], [0], [0]>} : vector<2x8x16xbf16>, vector<2x16x64xbf16>, vector<2x8x64xf32> -> vector<2x8x64xf32>
    "tpu.trace_stop"() : () -> ()
    %97 = vector.shape_cast %96 : vector<2x8x64xf32> to vector<16x64xf32>
    %98 = arith.truncf %97 : vector<16x64xf32> to vector<16x64xbf16>
    %c0_40 = arith.constant 0 : index
    %c0_41 = arith.constant 0 : index
    %99 = vector.load %arg9[%c0_40, %c0_41] : memref<64x256xbf16, #tpu.memory_space<vmem>>, vector<64x256xbf16>
    %cst_42 = arith.constant dense<0.000000e+00> : vector<16x256xf32>
    %100 = tpu.matmul %98, %99, %cst_42 {dimension_numbers = #tpu.dot_dimension_numbers<[1], [0], [0], [1], [0, 0, 1, 1], [], []>} : vector<16x64xbf16>, vector<64x256xbf16>, vector<16x256xf32> -> vector<16x256xf32>
    %101 = vector.shape_cast %100 : vector<16x256xf32> to vector<2x8x256xf32>
    %102 = arith.addf %101, %63 : vector<2x8x256xf32>
    %cst_43 = arith.constant dense<0.000000e+00> : vector<2x8xf32>
    %103 = vector.multi_reduction <add>, %102, %cst_43 [2] : vector<2x8x256xf32> to vector<2x8xf32>
    %104 = vector.shape_cast %103 : vector<2x8xf32> to vector<2x8x1xf32>
    %cst_44 = arith.constant 2.560000e+02 : f32
    %105 = vector.broadcast %cst_44 : f32 to vector<2x8x1xf32>
    %106 = arith.divf %104, %105 : vector<2x8x1xf32>
    %107 = vector.broadcast %106 : vector<2x8x1xf32> to vector<2x8x256xf32>
    %108 = arith.subf %102, %107 : vector<2x8x256xf32>
    %109 = arith.mulf %108, %108 : vector<2x8x256xf32>
    %cst_45 = arith.constant dense<0.000000e+00> : vector<2x8xf32>
    %110 = vector.multi_reduction <add>, %109, %cst_45 [2] : vector<2x8x256xf32> to vector<2x8xf32>
    %111 = vector.shape_cast %110 : vector<2x8xf32> to vector<2x8x1xf32>
    %cst_46 = arith.constant 2.560000e+02 : f32
    %112 = vector.broadcast %cst_46 : f32 to vector<2x8x1xf32>
    %113 = arith.divf %111, %112 : vector<2x8x1xf32>
    %114 = vector.broadcast %106 : vector<2x8x1xf32> to vector<2x8x256xf32>
    %115 = arith.subf %102, %114 : vector<2x8x256xf32>
    %cst_47 = arith.constant 9.99999974E-6 : f32
    %116 = vector.broadcast %cst_47 : f32 to vector<2x8x1xf32>
    %117 = arith.addf %113, %116 : vector<2x8x1xf32>
    %118 = math.rsqrt %117 : vector<2x8x1xf32>
    %119 = vector.broadcast %118 : vector<2x8x1xf32> to vector<2x8x256xf32>
    %120 = arith.mulf %115, %119 : vector<2x8x256xf32>
    %121 = vector.shape_cast %120 : vector<2x8x256xf32> to vector<16x256xf32>
    %122 = arith.truncf %121 : vector<16x256xf32> to vector<16x256xbf16>
    %c0_48 = arith.constant 0 : index
    %c0_49 = arith.constant 0 : index
    %123 = vector.load %arg10[%c0_48, %c0_49] : memref<256x256xbf16, #tpu.memory_space<vmem>>, vector<256x256xbf16>
    %cst_50 = arith.constant dense<0.000000e+00> : vector<16x256xf32>
    %124 = tpu.matmul %122, %123, %cst_50 {dimension_numbers = #tpu.dot_dimension_numbers<[1], [0], [0], [1], [0, 0, 1, 1], [], []>} : vector<16x256xbf16>, vector<256x256xbf16>, vector<16x256xf32> -> vector<16x256xf32>
    %cst_51 = arith.constant 0.000000e+00 : f32
    %125 = vector.broadcast %cst_51 : f32 to vector<16x256xf32>
    %126 = arith.maximumf %124, %125 : vector<16x256xf32>
    %127 = arith.truncf %126 : vector<16x256xf32> to vector<16x256xbf16>
    %c0_52 = arith.constant 0 : index
    %c0_53 = arith.constant 0 : index
    %128 = vector.load %arg11[%c0_52, %c0_53] : memref<256x256xbf16, #tpu.memory_space<vmem>>, vector<256x256xbf16>
    %cst_54 = arith.constant dense<0.000000e+00> : vector<16x256xf32>
    %129 = tpu.matmul %127, %128, %cst_54 {dimension_numbers = #tpu.dot_dimension_numbers<[1], [0], [0], [1], [0, 0, 1, 1], [], []>} : vector<16x256xbf16>, vector<256x256xbf16>, vector<16x256xf32> -> vector<16x256xf32>
    %130 = vector.shape_cast %129 : vector<16x256xf32> to vector<2x8x256xf32>
    %131 = arith.addf %130, %120 : vector<2x8x256xf32>
    %cst_55 = arith.constant dense<0.000000e+00> : vector<2x8xf32>
    %132 = vector.multi_reduction <add>, %131, %cst_55 [2] : vector<2x8x256xf32> to vector<2x8xf32>
    %133 = vector.shape_cast %132 : vector<2x8xf32> to vector<2x8x1xf32>
    %cst_56 = arith.constant 2.560000e+02 : f32
    %134 = vector.broadcast %cst_56 : f32 to vector<2x8x1xf32>
    %135 = arith.divf %133, %134 : vector<2x8x1xf32>
    %136 = vector.broadcast %135 : vector<2x8x1xf32> to vector<2x8x256xf32>
    %137 = arith.subf %131, %136 : vector<2x8x256xf32>
    %138 = arith.mulf %137, %137 : vector<2x8x256xf32>
    %cst_57 = arith.constant dense<0.000000e+00> : vector<2x8xf32>
    %139 = vector.multi_reduction <add>, %138, %cst_57 [2] : vector<2x8x256xf32> to vector<2x8xf32>
    %140 = vector.shape_cast %139 : vector<2x8xf32> to vector<2x8x1xf32>
    %cst_58 = arith.constant 2.560000e+02 : f32
    %141 = vector.broadcast %cst_58 : f32 to vector<2x8x1xf32>
    %142 = arith.divf %140, %141 : vector<2x8x1xf32>
    %143 = vector.broadcast %135 : vector<2x8x1xf32> to vector<2x8x256xf32>
    %144 = arith.subf %131, %143 : vector<2x8x256xf32>
    %cst_59 = arith.constant 9.99999974E-6 : f32
    %145 = vector.broadcast %cst_59 : f32 to vector<2x8x1xf32>
    %146 = arith.addf %142, %145 : vector<2x8x1xf32>
    %147 = math.rsqrt %146 : vector<2x8x1xf32>
    %148 = vector.broadcast %147 : vector<2x8x1xf32> to vector<2x8x256xf32>
    %149 = arith.mulf %144, %148 : vector<2x8x256xf32>
    %c0_60 = arith.constant 0 : index
    %c0_61 = arith.constant 0 : index
    %c0_62 = arith.constant 0 : index
    %150 = vector.load %arg12[%c0_60, %c0_61, %c0_62] : memref<2x8x256xf32, #tpu.memory_space<vmem>>, vector<2x8x256xf32>
    tpu.vector_store %arg12[%c0_60, %c0_61, %c0_62], %149 {strides = array<i32>} : memref<2x8x256xf32, #tpu.memory_space<vmem>>, vector<2x8x256xf32>,
    return
  }
  func.func @transform_0(%arg0: i32) -> (i32, i32, i32) {
    %c0_i32 = arith.constant 0 : i32
    %c0_i32_0 = arith.constant 0 : i32
    %c0_i32_1 = arith.constant 0 : i32
    return %arg0, %c0_i32, %c0_i32_0 : i32, i32, i32
  }
  func.func @transform_1(%arg0: i32) -> (i32, i32, i32) {
    %c0_i32 = arith.constant 0 : i32
    %c0_i32_0 = arith.constant 0 : i32
    %c0_i32_1 = arith.constant 0 : i32
    return %arg0, %c0_i32, %c0_i32_0 : i32, i32, i32
  }
  func.func @transform_2(%arg0: i32) -> (i32, i32, i32) {
    %c0_i32 = arith.constant 0 : i32
    %c0_i32_0 = arith.constant 0 : i32
    %c0_i32_1 = arith.constant 0 : i32
    return %arg0, %c0_i32, %c0_i32_0 : i32, i32, i32
  }
  func.func @transform_3(%arg0: i32) -> (i32, i32, i32) {
    %c0_i32 = arith.constant 0 : i32
    %c0_i32_0 = arith.constant 0 : i32
    %c0_i32_1 = arith.constant 0 : i32
    return %arg0, %c0_i32, %c0_i32_0 : i32, i32, i32
  }
  func.func @transform_4(%arg0: i32) -> (i32, i32) {
    %c0_i32 = arith.constant 0 : i32
    %c0_i32_0 = arith.constant 0 : i32
    %c0_i32_1 = arith.constant 0 : i32
    return %c0_i32, %c0_i32_0 : i32, i32
  }
  func.func @transform_5(%arg0: i32) -> (i32, i32) {
    %c0_i32 = arith.constant 0 : i32
    %c0_i32_0 = arith.constant 0 : i32
    %c0_i32_1 = arith.constant 0 : i32
    return %c0_i32, %c0_i32_0 : i32, i32
  }
  func.func @transform_6(%arg0: i32) -> (i32, i32) {
    %c0_i32 = arith.constant 0 : i32
    %c0_i32_0 = arith.constant 0 : i32
    %c0_i32_1 = arith.constant 0 : i32
    return %c0_i32, %c0_i32_0 : i32, i32
  }
  func.func @transform_7(%arg0: i32) -> (i32, i32) {
    %c0_i32 = arith.constant 0 : i32
    %c0_i32_0 = arith.constant 0 : i32
    %c0_i32_1 = arith.constant 0 : i32
    return %c0_i32, %c0_i32_0 : i32, i32
  }
  func.func @transform_8(%arg0: i32) -> (i32, i32) {
    %c0_i32 = arith.constant 0 : i32
    %c0_i32_0 = arith.constant 0 : i32
    %c0_i32_1 = arith.constant 0 : i32
    return %c0_i32, %c0_i32_0 : i32, i32
  }
  func.func @transform_9(%arg0: i32) -> (i32, i32) {
    %c0_i32 = arith.constant 0 : i32
    %c0_i32_0 = arith.constant 0 : i32
    %c0_i32_1 = arith.constant 0 : i32
    return %c0_i32, %c0_i32_0 : i32, i32
  }
  func.func @transform_10(%arg0: i32) -> (i32, i32) {
    %c0_i32 = arith.constant 0 : i32
    %c0_i32_0 = arith.constant 0 : i32
    %c0_i32_1 = arith.constant 0 : i32
    return %c0_i32, %c0_i32_0 : i32, i32
  }
  func.func @transform_11(%arg0: i32) -> (i32, i32, i32) {
    %c0_i32 = arith.constant 0 : i32
    %c0_i32_0 = arith.constant 0 : i32
    %c0_i32_1 = arith.constant 0 : i32
    return %arg0, %c0_i32, %c0_i32_0 : i32, i32, i32
  }
}

</mosaic_0001>

<bundles_post_ra>
// kernel: tpu_custom_call.1
= control target key start
LH: loop header
LB: loop body
LE: loop exit
PB: predicated region body
PF: predicated region fallthrough
CT: control target
= control target key end

     0   :  { %16 = vsyncpa [#allocation3], 0  ;;  %s3558_s0 = inlined_call_operand.hbm [shape: f32[2,8,256], index: 0, kind: input, shape index: {}]   ;;  %s3559_s1 = inlined_call_operand.vmem [shape: f32[2,16,256], index: 1, kind: input, shape index: {}]   ;;  %s3560_s2 = inlined_call_operand.hbm [shape: s8[2,8,8], index: 2, kind: input, shape index: {}]   ;;  %s3561_s3 = inlined_call_operand.hbm [shape: s8[2,8,16], index: 3, kind: input, shape index: {}]   ;;  %s3562_s4 = inlined_call_operand.vmem [shape: bf16[256,192], index: 4, kind: input, shape index: {}]   ;;  %s3563_s5 = inlined_call_operand.hbm [shape: bf16[64,256], index: 5, kind: input, shape index: {}]   ;;  %s3564_s6 = inlined_call_operand.vmem [shape: bf16[256,64], index: 6, kind: input, shape index: {}]   ;;  %s3565_s7 = inlined_call_operand.vmem [shape: bf16[256,128], index: 7, kind: input, shape index: {}]   ;;  %s3566_s8 = inlined_call_operand.hbm [shape: bf16[64,256], index: 8, kind: input, shape index: {}]   ;;  %s3567_s9 = inlined_call_operand.vmem [shape: bf16[256,256], index: 9, kind: input, shape index: {}]   ;;  %s3568_s10 = inlined_call_operand.hbm [shape: bf16[256,256], index: 10, kind: input, shape index: {}]   ;;  %s3569_s11 = inlined_call_operand.hbm [shape: f32[2,8,256], index: 11, kind: output, shape index: {}]  }
   0x1   :  { %17 = vsyncpa [#allocation6], 0 }
   0x2   :  { %18 = vsyncpa [#allocation9], 0 }
   0x3   :  { %19 = vsyncpa [#allocation12], 0  ;;  %s40_s19 = sshll.u32 %s3560_s2, 4  ;;  %s41_s19 = int_to_ptr.hbm [resolvable:$true] %s40_s19 }
   0x4   :  { %20 = vsyncpa [#allocation4], 0  ;;  %s2800_s20 = smov [#allocation5]   ;;  %s68_s24 = sshll.u32 %s3563_s5, 4  ;;  %s69_s24 = int_to_ptr.hbm [resolvable:$true] %s68_s24 }
   0x5   :  { %s42_s21 = sshll.u32 %s2800_s20, 4  ;;  %s2801_s25 = smov 32   ;;  %s43_s21 = int_to_ptr.vmem [resolvable:$true] %s42_s21 }
   0x6   :  { %s2802_s26 = smov 2   ;;  %s2803_s27 = smov [#allocation8]  }
   0x7   :  { %48 = dma.hbm_to_vmem [thread:$0]  %s41_s19, 64, %s43_s21, [#allocation6], %s2801_s25, %s2801_s25, %s2802_s26  }
   0x8   :  { %s70_s28 = sshll.u32 %s2803_s27, 4  ;;  %s2804_s29 = smov 128   ;;  %s71_s28 = int_to_ptr.vmem [resolvable:$true] %s70_s28 }
   0x9   :  { %s2805_s30 = smov 8   ;;  %s25_s13 = sshll.u32 %s3558_s0, 4  ;;  %s26_s13 = int_to_ptr.hbm [resolvable:$true] %s25_s13 }
   0xa   :  { %76 = dma.hbm_to_vmem [thread:$0]  %s69_s24, 1024, %s71_s28, [#allocation9], %s2804_s29, %s2804_s29, %s2805_s30  }
   0xb   :  { %s2806_s14 = smov [#allocation2]   ;;  %s53_s17 = sshll.u32 %s3561_s3, 4  ;;  %s54_s17 = int_to_ptr.hbm [resolvable:$true] %s53_s17 }
   0xc   :  { %s27_s5 = sshll.u32 %s2806_s14, 4  ;;  %s2807_s18 = smov 256   ;;  %s28_s5 = int_to_ptr.vmem [resolvable:$true] %s27_s5 }
   0xd   :  { %s2808_s19 = smov 16   ;;  %s2809_s20 = smov [#allocation7]  }
   0xe   :  { %33 = dma.hbm_to_vmem [thread:$0]  %s26_s13, 512, %s28_s5, [#allocation3], %s2807_s18, %s2807_s18, %s2808_s19  }
   0xf   :  { %s55_s21 = sshll.u32 %s2809_s20, 4  ;;  %s85_s0 = sshll.u32 %s3566_s8, 4  ;;  %s56_s21 = int_to_ptr.vmem [resolvable:$true] %s55_s21  ;;  %s86_s0 = int_to_ptr.hbm [resolvable:$true] %s85_s0 }
  0x10   :  { %61 = dma.hbm_to_vmem [thread:$0]  %s54_s17, 64, %s56_s21, [#allocation6], %s2801_s25, %s2801_s25, %s2802_s26  }
  0x11   :  { %s100_s3 = sshll.u32 %s3568_s10, 4  ;;  %s2810_s28 = smov [#allocation10]   ;;  %s101_s3 = int_to_ptr.hbm [resolvable:$true] %s100_s3 }
  0x12   :  { %s87_s2 = sshll.u32 %s2810_s28, 4  ;;  %s2811_s12 = smov [#allocation11]   ;;  %s88_s2 = int_to_ptr.vmem [resolvable:$true] %s87_s2 }
  0x13   :  { %93 = dma.hbm_to_vmem [thread:$0]  %s86_s0, 1024, %s88_s2, [#allocation9], %s2804_s29, %s2804_s29, %s2805_s30  }
  0x14   :  { %s102_s13 = sshll.u32 %s2811_s12, 4  ;;  %s103_s13 = int_to_ptr.vmem [resolvable:$true] %s102_s13 }
  0x15   :  { %108 = dma.hbm_to_vmem [thread:$0]  %s101_s3, 4096, %s103_s13, [#allocation12], %s2804_s29, %s2804_s29, %s2805_s30  }
  0x16   :  { %2790 = dma.done.wait [#allocation3], 512  }
  0x17   :  { %2791 = vsyncadd [#allocation3], 4294966784 }
  0x18   :  { %2792 = dma.done.wait [#allocation6], 128  }
  0x19   :  { %2793 = vsyncadd [#allocation6], 4294967168 }
  0x1a   :  { %2794 = dma.done.wait [#allocation9], 2048  }
  0x1b   :  { %2795 = vsyncadd [#allocation9], 4294965248 }
  0x1c   :  { %2796 = dma.done.wait [#allocation12], 4096  }
  0x1d   :  { %2797 = vsyncadd [#allocation12], 4294963200  ;;  %v1895_v0 = vld [vmem:[%s3562_s4 + $0x70] sm:$0xf]  ;;  %v2440_v1 = vld [vmem:[%s3562_s4 + $0x74] sm:$0xf0] }
  0x1e   :  { %v1959_v2 = vld [vmem:[%s3562_s4 + $0xf0] sm:$0xf]  ;;  %v1896_v3 = vor.u32 %v2440_v1, %v1895_v0  ;;  %v2456_v4 = vld [vmem:[%s3562_s4 + $0xf4] sm:$0xf0]  ;;  %v1887_v5 = vld [vmem:[%s3562_s4 + $0x60] sm:$0xf] }
  0x1f   :  { %v2438_v6 = vld [vmem:[%s3562_s4 + $0x64] sm:$0xf0]  ;;  %v1960_v7 = vor.u32 %v2456_v4, %v1959_v2  ;;  %v1951_v8 = vld [vmem:[%s3562_s4 + $0xe0] sm:$0xf]  ;;  %v1879_v12 = vld [vmem:[%s3562_s4 + $0x50] sm:$0xf] }
  0x20   :  { %v2454_v9 = vld [vmem:[%s3562_s4 + $0xe4] sm:$0xf0]  ;;  %352 = vmatpush.bf16.msra.mxu0 %v1896_v3  ;;  %v1888_v10 = vor.u32 %v2438_v6, %v1887_v5  ;;  %v2436_v13 = vld [vmem:[%s3562_s4 + $0x54] sm:$0xf0]  ;;  %v1943_v14 = vld [vmem:[%s3562_s4 + $0xd0] sm:$0xf] }
  0x21   :  { %366 = vmatpush.bf16.msra.mxu1 %v1960_v7  ;;  %v1952_v11 = vor.u32 %v2454_v9, %v1951_v8  ;;  %v2452_v15 = vld [vmem:[%s3562_s4 + $0xd4] sm:$0xf0]  ;;  %v1880_v16 = vor.u32 %v2436_v13, %v1879_v12  ;;  %v1871_v18 = vld [vmem:[%s3562_s4 + $0x40] sm:$0xf]  ;;  %v2434_v19 = vld [vmem:[%s3562_s4 + $0x44] sm:$0xf0] }
  0x22   :  { %v1944_v17 = vor.u32 %v2452_v15, %v1943_v14  ;;  %v1935_v20 = vld [vmem:[%s3562_s4 + $0xc0] sm:$0xf]  ;;  %v2450_v21 = vld [vmem:[%s3562_s4 + $0xc4] sm:$0xf0]  ;;  %v1872_v22 = vor.u32 %v2434_v19, %v1871_v18  ;;  %v1863_v24 = vld [vmem:[%s3562_s4 + $0x30] sm:$0xf] }
  0x23   :  { %v1936_v23 = vor.u32 %v2450_v21, %v1935_v20  ;;  %v2432_v25 = vld [vmem:[%s3562_s4 + $0x34] sm:$0xf0]  ;;  %v1927_v26 = vld [vmem:[%s3562_s4 + $0xb0] sm:$0xf]  ;;  %v1855_v30 = vld [vmem:[%s3562_s4 + $0x20] sm:$0xf] }
  0x24   :  { %353 = vmatpush.bf16.msra.mxu0 %v1888_v10  ;;  %v2448_v27 = vld [vmem:[%s3562_s4 + $0xb4] sm:$0xf0]  ;;  %v1864_v28 = vor.u32 %v2432_v25, %v1863_v24  ;;  %v2430_v31 = vld [vmem:[%s3562_s4 + $0x24] sm:$0xf0]  ;;  %v1919_v32 = vld [vmem:[%s3562_s4 + $0xa0] sm:$0xf] }
  0x25   :  { %367 = vmatpush.bf16.msra.mxu1 %v1952_v11  ;;  %v1928_v29 = vor.u32 %v2448_v27, %v1927_v26  ;;  %v2446_v33 = vld [vmem:[%s3562_s4 + $0xa4] sm:$0xf0]  ;;  %v1856_v34 = vor.u32 %v2430_v31, %v1855_v30  ;;  %v1847_v36 = vld [vmem:[%s3562_s4 + $0x10] sm:$0xf]  ;;  %v2428_v37 = vld [vmem:[%s3562_s4 + $0x14] sm:$0xf0] }
  0x26   :  { %v1920_v35 = vor.u32 %v2446_v33, %v1919_v32  ;;  %v1911_v38 = vld [vmem:[%s3562_s4 + $0x90] sm:$0xf]  ;;  %v2444_v39 = vld [vmem:[%s3562_s4 + $0x94] sm:$0xf0]  ;;  %v1848_v40 = vor.u32 %v2428_v37, %v1847_v36  ;;  %v1839_v42 = vld [vmem:[%s3562_s4] sm:$0xf] }
  0x27   :  { %v1912_v41 = vor.u32 %v2444_v39, %v1911_v38  ;;  %v2426_v43 = vld [vmem:[%s3562_s4 + $0x4] sm:$0xf0]  ;;  %v1903_v44 = vld [vmem:[%s3562_s4 + $0x80] sm:$0xf]  ;;  %v3003_v48 = vld [vmem:[#allocation2 + $0x10] sm:$0xff]  ;;  %s2812_s3 = smov 64  }
  0x28   :  { %354 = vmatpush.bf16.msra.mxu0 %v1880_v16  ;;  %v2442_v45 = vld [vmem:[%s3562_s4 + $0x84] sm:$0xf0]  ;;  %v1840_v46 = vor.u32 %v2426_v43, %v1839_v42  ;;  %v3001_v47 = vld [vmem:[#allocation2] sm:$0xff]  ;;  %v3007_v51 = vld [vmem:[#allocation2 + $0x18] sm:$0xff]  ;;  %vm415_vm0 = vcmask 523264   ;;  %vm461_vm1 = vcmask 64512  }
  0x29   :  { %368 = vmatpush.bf16.msra.mxu1 %v1944_v17  ;;  %v1904_v49 = vor.u32 %v2442_v45, %v1903_v44  ;;  %v3005_v50 = vld [vmem:[#allocation2 + $0x8] sm:$0xff]  ;;  %v3011_v52 = vpack.c.bf16 %v3003_v48, %v3001_v47  ;;  %v2439_v6 = vld [vmem:[%s3562_s4 + $0x74] sm:$0xf]  ;;  %v1897_v7 = vld [vmem:[%s3562_s4 + $0x78] sm:$0xf0]  ;;  %vm493_vm4 = vcmask 1043456  }
  0x2a   :  { %v3015_v53 = vpack.c.bf16 %v3007_v51, %v3005_v50  ;;  %v2455_v8 = vld [vmem:[%s3562_s4 + $0xf4] sm:$0xf]  ;;  %v1900_v9 = vor.u32 %v2439_v6, %v1897_v7  ;;  %v1961_v10 = vld [vmem:[%s3562_s4 + $0xf8] sm:$0xf0]  ;;  %v2437_v11 = vld [vmem:[%s3562_s4 + $0x64] sm:$0xf] }
  0x2b   :  { %v1889_v12 = vld [vmem:[%s3562_s4 + $0x68] sm:$0xf0]  ;;  %v1964_v13 = vor.u32 %v2455_v8, %v1961_v10  ;;  %v2453_v14 = vld [vmem:[%s3562_s4 + $0xe4] sm:$0xf]  ;;  %v2435_v18 = vld [vmem:[%s3562_s4 + $0x54] sm:$0xf] }
  0x2c   :  { %355 = vmatpush.bf16.msra.mxu0 %v1872_v22  ;;  %v1953_v15 = vld [vmem:[%s3562_s4 + $0xe8] sm:$0xf0]  ;;  %380 = vmatpush.bf16.msra.mxu2 %v1900_v9  ;;  %v1892_v16 = vor.u32 %v2437_v11, %v1889_v12  ;;  %v1881_v19 = vld [vmem:[%s3562_s4 + $0x58] sm:$0xf0]  ;;  %v2451_v20 = vld [vmem:[%s3562_s4 + $0xd4] sm:$0xf] }
  0x2d   :  { %369 = vmatpush.bf16.msra.mxu1 %v1936_v23  ;;  %394 = vmatpush.bf16.msra.mxu3 %v1964_v13  ;;  %v1956_v17 = vor.u32 %v2453_v14, %v1953_v15  ;;  %v1945_v21 = vld [vmem:[%s3562_s4 + $0xd8] sm:$0xf0]  ;;  %v1884_v22 = vor.u32 %v2435_v18, %v1881_v19  ;;  %v2433_v24 = vld [vmem:[%s3562_s4 + $0x44] sm:$0xf]  ;;  %v1873_v25 = vld [vmem:[%s3562_s4 + $0x48] sm:$0xf0] }
  0x2e   :  { %v1948_v23 = vor.u32 %v2451_v20, %v1945_v21  ;;  %v2449_v26 = vld [vmem:[%s3562_s4 + $0xc4] sm:$0xf]  ;;  %v1937_v27 = vld [vmem:[%s3562_s4 + $0xc8] sm:$0xf0]  ;;  %v2431_v30 = vld [vmem:[%s3562_s4 + $0x34] sm:$0xf] }
  0x2f   :  { %v1865_v31 = vld [vmem:[%s3562_s4 + $0x38] sm:$0xf0]  ;;  %v2447_v32 = vld [vmem:[%s3562_s4 + $0xb4] sm:$0xf]  ;;  %v2429_v37 = vld [vmem:[%s3562_s4 + $0x24] sm:$0xf] }
  0x30   :  { %356 = vmatpush.bf16.msra.mxu0 %v1864_v28  ;;  %381 = vmatpush.bf16.msra.mxu2 %v1892_v16  ;;  %v1876_v28 = vor.u32 %v2433_v24, %v1873_v25  ;;  %v1929_v33 = vld [vmem:[%s3562_s4 + $0xb8] sm:$0xf0]  ;;  %v1857_v38 = vld [vmem:[%s3562_s4 + $0x28] sm:$0xf0]  ;;  %v2427_v45 = vld [vmem:[%s3562_s4 + $0x14] sm:$0xf] }
  0x31   :  { %370 = vmatpush.bf16.msra.mxu1 %v1928_v29  ;;  %395 = vmatpush.bf16.msra.mxu3 %v1956_v17  ;;  %v1940_v29 = vor.u32 %v2449_v26, %v1937_v27  ;;  %v1932_v36 = vor.u32 %v2447_v32, %v1929_v33  ;;  %v1860_v43 = vor.u32 %v2429_v37, %v1857_v38  ;;  %v2570_v6 = vld [vmem:[#allocation5] sm:$0xf]   ;;  %v1995_v27 = vld [vmem:[#allocation8 + $0x30] sm:$0xf]  ;;  %vm1054_vm12 = vcmask 130048   ;;  %s1821_s2 = sshll.u32 %s3569_s11, 4  ;;  %s1822_s2 = int_to_ptr.hbm [resolvable:$true] %s1821_s2 }
  0x32   :  { %v2571_v8 = vunpack.c.0.s8 %v2570_v6  ;;  %v2572_v15 = vunpack.c.1.s8 %v2570_v6 }
  0x34   :  { %357 = vmatpush.bf16.msra.mxu0 %v1856_v34  ;;  %382 = vmatpush.bf16.msra.mxu2 %v1884_v22  ;;  %v1868_v34 = vor.u32 %v2431_v30, %v1865_v31  ;;  %vm150_vm2 = vcmp.ne.s32.totalorder %v2571_v8, 0  ;;  %vm151_vm3 = vcmp.ne.s32.totalorder %v2572_v15, 0  ;;  %v1997_v31 = vld [vmem:[#allocation8 + $0x38] sm:$0xf0] }
  0x35   :  { %371 = vmatpush.bf16.msra.mxu1 %v1920_v35  ;;  %396 = vmatpush.bf16.msra.mxu3 %v1948_v23 }
  0x38   :  { %358 = vmatpush.bf16.msra.mxu0 %v1848_v40  ;;  %383 = vmatpush.bf16.msra.mxu2 %v1876_v28  ;;  %v2445_v40 = vld [vmem:[%s3562_s4 + $0xa4] sm:$0xf]  ;;  %v2464_v28 = vld [vmem:[#allocation8 + $0x34] sm:$0xf0] }
  0x39   :  { %372 = vmatpush.bf16.msra.mxu1 %v1912_v41  ;;  %397 = vmatpush.bf16.msra.mxu3 %v1940_v29  ;;  %v1921_v41 = vld [vmem:[%s3562_s4 + $0xa8] sm:$0xf0]  ;;  %v2463_v29 = vld [vmem:[#allocation8 + $0x34] sm:$0xf]  ;;  %v1996_v30 = vor.u32 %v2464_v28, %v1995_v27 }
  0x3a   :  { %v1924_v44 = vor.u32 %v2445_v40, %v1921_v41  ;;  %v2000_v32 = vor.u32 %v2463_v29, %v1997_v31  ;;  %v1987_v41 = vld [vmem:[#allocation8 + $0x20] sm:$0xf]  ;;  %v2483_v31 = vld [vmem:[%s3565_s7 + $0x10] sm:$0xff] }
  0x3c   :  { %359 = vmatpush.bf16.msra.mxu0 %v1840_v46  ;;  %384 = vmatpush.bf16.msra.mxu2 %v1868_v34  ;;  %v1849_v46 = vld [vmem:[%s3562_s4 + $0x18] sm:$0xf0] }
  0x3d   :  { %373 = vmatpush.bf16.msra.mxu1 %v1904_v49  ;;  %398 = vmatpush.bf16.msra.mxu3 %v1932_v36  ;;  %v2443_v49 = vld [vmem:[%s3562_s4 + $0x94] sm:$0xf] }
  0x3f   :  { %360 = vmatmul.bf16.vlgmr.msra.gmra.mxu0 %v3011_v52 }
  0x40   :  { %374 = vmatmul.bf16.vlgmr.msra.gmra.mxu1 %v3015_v53  ;;  %385 = vmatpush.bf16.msra.mxu2 %v1860_v43  ;;  %v2461_v43 = vld [vmem:[#allocation8 + $0x24] sm:$0xf] }
  0x41   :  { %399 = vmatpush.bf16.msra.mxu3 %v1924_v44 }
  0xbc   :  { %v361_v54 = vpop.f32.mrf.mxu0 }
  0xbd   :  { %v375_v55 = vpop.f32.mrf.mxu1 }
  0xbe   :  { %v376_v56 = vadd.f32 %v375_v55, %v361_v54  ;;  %v1913_v54 = vld [vmem:[%s3562_s4 + $0x98] sm:$0xf0]  ;;  %v1852_v55 = vor.u32 %v2427_v45, %v1849_v46  ;;  %v1989_v45 = vld [vmem:[#allocation8 + $0x28] sm:$0xf0] }
  0xbf   :  { %v1992_v46 = vor.u32 %v2461_v43, %v1989_v45  ;;  %v2481_v45 = vld [vmem:[%s3565_s7] sm:$0xff] }
  0xc0   :  { %v408_v57 = vpack.c.bf16 %v376_v56, %v376_v56  ;;  %386 = vmatpush.bf16.msra.mxu2 %v1852_v55  ;;  %v2459_v55 = vld [vmem:[#allocation8 + $0x14] sm:$0xf] }
  0xc2   :  { %v411_v58 = vunpack.c.l.b16 %v408_v57 }
  0xc4   :  { %v363_v59 = vpop.f32.mrf.mxu0  ;;  %v412_v60 = vpack.c.b16 %v411_v58, %v411_v58  ;;  %v1916_v58 = vor.u32 %v2443_v49, %v1913_v54  ;;  %v1979_v49 = vld [vmem:[#allocation8 + $0x10] sm:$0xf]  ;;  %v2460_v54 = vld [vmem:[#allocation8 + $0x14] sm:$0xf0] }
  0xc5   :  { %v377_v61 = vpop.f32.mrf.mxu1 }
  0xc6   :  { %v378_v62 = vadd.f32 %v377_v61, %v363_v59  ;;  %413 = vrot.lane.b32.xlu0 %v412_v60, %s2812_s3  ;;  %v2425_v59 = vld [vmem:[%s3562_s4 + $0x4] sm:$0xf]  ;;  %v1841_v60 = vld [vmem:[%s3562_s4 + $0x8] sm:$0xf0]  ;;  %400 = vmatpush.bf16.msra.mxu3 %v1916_v58 }
  0xc8   :  { %v409_v63 = vpack.c.bf16 %v378_v62, %v378_v62  ;;  %v2441_v62 = vld [vmem:[%s3562_s4 + $0x84] sm:$0xf] }
  0xca   :  { %v436_v0 = vunpack.c.l.b16 %v409_v63 }
  0xcc   :  { %v437_v1 = vpack.c.b16 %v436_v0, %v436_v0 }
  0xce   :  { %438 = vrot.lane.b32.xlu0 %v437_v1, %s2812_s3  ;;  %v1844_v1 = vor.u32 %v2425_v59, %v1841_v60  ;;  %v1971_v59 = vld [vmem:[#allocation8] sm:$0xf]  ;;  %v2458_v60 = vld [vmem:[#allocation8 + $0x4] sm:$0xf0] }
  0xd0   :  { %387 = vmatpush.bf16.msra.mxu2 %v1844_v1 }
  0xd3   :  { %388 = vmatmul.bf16.vlgmr.msra.gmra.mxu2 %v3011_v52 }
 0x138   :  { %v414_v2 = vpop.permute.xlu0 %413 }
 0x139   :  { %v420_v3 = vsel %vm415_vm0, %v414_v2, 0 }
 0x13a   :  { %429 = vmatpush.bf16.xpose.msrb.mxu0 %v420_v3 }
 0x140   :  { %v439_v4 = vpop.permute.xlu0 %438 }
 0x141   :  { %1965 = vmatmul.msk.bf16.vlgmr.msrb.gmra.mxu0 %vm415_vm0, %v408_v57  ;;  %v444_v5 = vsel %vm415_vm0, %v439_v4, 0 }
 0x142   :  { %453 = vmatpush.bf16.xpose.msrb.mxu1 %v444_v5  ;;  %585 = vmatpush.bf16.msra.mxu0 %v1996_v30 }
 0x149   :  { %1966 = vmatmul.msk.bf16.vlgmr.msrb.gmra.mxu1 %vm415_vm0, %v409_v63  ;;  %v1905_v63 = vld [vmem:[%s3562_s4 + $0x88] sm:$0xf0] }
 0x14a   :  { %v1908_v2 = vor.u32 %v2441_v62, %v1905_v63  ;;  %599 = vmatpush.bf16.msra.mxu1 %v2000_v32  ;;  %v1972_v62 = vor.u32 %v2458_v60, %v1971_v59  ;;  %v1973_v63 = vld [vmem:[#allocation8 + $0x8] sm:$0xf0] }
 0x14b   :  { %v2491_v32 = vld [vmem:[%s3565_s7 + $0x50] sm:$0xff] }
 0x14c   :  { %401 = vmatpush.bf16.msra.mxu3 %v1908_v2 }
 0x14e   :  { %600 = vmatpush.bf16.msra.mxu1 %v1992_v46  ;;  %v2489_v46 = vld [vmem:[%s3565_s7 + $0x40] sm:$0xff] }
 0x14f   :  { %402 = vmatmul.bf16.vlgmr.msra.gmra.mxu3 %v3015_v53 }
 0x156   :  { %v389_v17 = vpop.f32.mrf.mxu2 }
 0x15e   :  { %v391_v20 = vpop.f32.mrf.mxu2 }
 0x1be   :  { %v431_v35 = vpop.f32.mrf.mxu0 }
 0x1bf   :  { %v459_v39 = vmul.f32 0.125, %v431_v35 }
 0x1c1   :  { %v462_v42 = vsel %vm461_vm1, %v459_v39, -inf }
 0x1c2   :  { %463 = vmax.xlane.f32.xlu1 %v462_v42  ;;  %v2462_v42 = vld [vmem:[#allocation8 + $0x24] sm:$0xf0] }
 0x1c3   :  { %v1988_v44 = vor.u32 %v2462_v42, %v1987_v41 }
 0x1c5   :  { %586 = vmatpush.bf16.msra.mxu0 %v1988_v44 }
 0x1c6   :  { %v433_v56 = vpop.f32.mrf.mxu0  ;;  %v455_v57 = vpop.f32.mrf.mxu1 }
 0x1c7   :  { %v460_v61 = vmul.f32 0.125, %v455_v57  ;;  %v1980_v56 = vor.u32 %v2460_v54, %v1979_v49  ;;  %v1981_v57 = vld [vmem:[#allocation8 + $0x18] sm:$0xf0]  ;;  %v2472_v49 = vld [vmem:[%s3564_s6 + $0x38] sm:$0xff] }
 0x1c8   :  { %v1984_v58 = vor.u32 %v2459_v55, %v1981_v57  ;;  %v2480_v54 = vld [vmem:[%s3564_s6 + $0x78] sm:$0xff]  ;;  %v138_v55 = vld [vmem:[%s3559_s1] sm:$0xff]  ;;  %v139_v57 = vld [vmem:[%s3559_s1 + $0x8] sm:$0xff] }
 0x1c9   :  { %v465_v0 = vsel %vm461_vm1, %v460_v61, -inf  ;;  %587 = vmatpush.bf16.msra.mxu0 %v1980_v56  ;;  %v140_v56 = vld [vmem:[%s3559_s1 + $0x10] sm:$0xff] }
 0x1ca   :  { %466 = vmax.xlane.f32.xlu1 %v465_v0  ;;  %601 = vmatpush.bf16.msra.mxu1 %v1984_v58  ;;  %v141_v58 = vld [vmem:[%s3559_s1 + $0x18] sm:$0xff]  ;;  %v672_v59 = vpack.c.bf16 %v140_v56, %v138_v55 }
 0x1cb   :  { %v673_v60 = vpack.c.bf16 %v141_v58, %v139_v57 }
 0x1cd   :  { %588 = vmatpush.bf16.msra.mxu0 %v1972_v62  ;;  %v2479_v62 = vld [vmem:[%s3564_s6 + $0x70] sm:$0xff] }
 0x1ce   :  { %v457_v3 = vpop.f32.mrf.mxu1 }
 0x1d2   :  { %v403_v18 = vpop.f32.mrf.mxu3 }
 0x1d3   :  { %v404_v19 = vadd.f32 %v403_v18, %v389_v17 }
 0x1d5   :  { %v488_v22 = vpack.c.bf16 %v404_v19, %v404_v19  ;;  %v2486_v19 = vld [vmem:[%s3565_s7 + $0x28] sm:$0xff] }
 0x1d7   :  { %v495_v25 = vsel %vm493_vm4, %v488_v22, 0  ;;  %v2485_v22 = vld [vmem:[%s3565_s7 + $0x20] sm:$0xff] }
 0x1d8   :  { %504 = vmatpush.bf16.msrb.mxu2 %v495_v25  ;;  %v2484_v25 = vld [vmem:[%s3565_s7 + $0x18] sm:$0xff] }
 0x1da   :  { %v405_v21 = vpop.f32.mrf.mxu3 }
 0x1db   :  { %v406_v23 = vadd.f32 %v405_v21, %v391_v20  ;;  %v2494_v20 = vld [vmem:[%s3565_s7 + $0x68] sm:$0xff] }
 0x1dc   :  { %804 = vmatpush.bf16.msra.mxu2 %v2472_v49 }
 0x1dd   :  { %v489_v24 = vpack.c.bf16 %v406_v23, %v406_v23  ;;  %v2493_v23 = vld [vmem:[%s3565_s7 + $0x60] sm:$0xff] }
 0x1df   :  { %v514_v26 = vsel %vm493_vm4, %v489_v24, 0 }
 0x1e0   :  { %523 = vmatpush.bf16.msrb.mxu3 %v514_v26  ;;  %v2492_v26 = vld [vmem:[%s3565_s7 + $0x58] sm:$0xff] }
 0x1e4   :  { %818 = vmatpush.bf16.msra.mxu3 %v2480_v54 }
 0x1e8   :  { %819 = vmatpush.bf16.msra.mxu3 %v2479_v62 }
 0x235   :  { %v464_v4 = vpop.xlane.xlu1 %463 }
 0x236   :  { %v468_v5 = vsub.f32 %v459_v39, %v464_v4 }
 0x238   :  { %v470_v7 = vmul.f32 1.442695, %v468_v5 }
 0x23a   :  { %2592 = vpow2.f32 %v470_v7 }
 0x23d   :  { %v467_v9 = vpop.xlane.xlu1 %466 }
 0x23e   :  { %v469_v10 = vsub.f32 %v460_v61, %v467_v9  ;;  %v2457_v61 = vld [vmem:[#allocation8 + $0x4] sm:$0xf] }
 0x23f   :  { %v1976_v0 = vor.u32 %v2457_v61, %v1973_v63  ;;  %v2471_v61 = vld [vmem:[%s3564_s6 + $0x30] sm:$0xff]  ;;  %v2470_v63 = vld [vmem:[%s3564_s6 + $0x28] sm:$0xff] }
 0x240   :  { %v2593_v11 = vpop.eup %2592  ;;  %v472_v12 = vmul.f32 1.442695, %v469_v10  ;;  %805 = vmatpush.bf16.msra.mxu2 %v2471_v61 }
 0x241   :  { %v474_v13 = vsel %vm150_vm2, 0.0, %v2593_v11  ;;  %602 = vmatpush.bf16.msra.mxu1 %v1976_v0  ;;  %v2478_v0 = vld [vmem:[%s3564_s6 + $0x68] sm:$0xff] }
 0x242   :  { %2594 = vpow2.f32 %v472_v12  ;;  %v476_v14 = vsel %vm461_vm1, %v474_v13, 0.0  ;;  %820 = vmatpush.bf16.msra.mxu3 %v2478_v0 }
 0x243   :  { %477 = vadd.xlane.f32.xlu2 %v476_v14 }
 0x244   :  { %806 = vmatpush.bf16.msra.mxu2 %v2470_v63 }
 0x248   :  { %v2595_v52 = vpop.eup %2594 }
 0x249   :  { %v475_v53 = vsel %vm151_vm3, 0.0, %v2595_v52  ;;  %v2813_v52 = vmov 256.0  }
 0x24a   :  { %v479_v16 = vsel %vm461_vm1, %v475_v53, 0.0 }
 0x24b   :  { %480 = vadd.xlane.f32.xlu2 %v479_v16 }
 0x2b6   :  { %v478_v33 = vpop.xlane.xlu2 %477 }
 0x2b7   :  { %2596 = vrcp.f32 %v478_v33 }
 0x2bd   :  { %v2597_v34 = vpop.eup %2596 }
 0x2be   :  { %v484_v35 = vmul.f32 %v2597_v34, %v474_v13  ;;  %v481_v36 = vpop.xlane.xlu2 %480 }
 0x2bf   :  { %2598 = vrcp.f32 %v481_v36  ;;  %v2482_v36 = vld [vmem:[%s3565_s7 + $0x8] sm:$0xff] }
 0x2c0   :  { %v486_v37 = vpack.c.bf16 %v484_v35, %v484_v35  ;;  %2600 = vrcp.f32 %v2813_v52  ;;  %v2473_v52 = vld [vmem:[%s3564_s6 + $0x40] sm:$0xff] }
 0x2c2   :  { %1967 = vmatmul.msk.bf16.vlgmr.msrb.gmra.mxu2 %vm461_vm1, %v486_v37  ;;  %v2490_v37 = vld [vmem:[%s3565_s7 + $0x48] sm:$0xff] }
 0x2c5   :  { %v2599_v38 = vpop.eup %2598 }
 0x2c6   :  { %v485_v39 = vmul.f32 %v2599_v38, %v475_v53  ;;  %v2601_v53 = vpop.eup %2600 }
 0x2c7   :  { %v620_v16 = vmul.f32 256.0, %v2601_v53  ;;  %vm624_vm5 = vweird.f32 %v2601_v53 }
 0x2c8   :  { %v487_v40 = vpack.c.bf16 %v485_v39, %v485_v39 }
 0x2c9   :  { %v621_v17 = vsub.f32 1.0, %v620_v16 }
 0x2ca   :  { %1968 = vmatmul.msk.bf16.vlgmr.msrb.gmra.mxu3 %vm461_vm1, %v487_v40 }
 0x2cb   :  { %v622_v18 = vmul.f32 %v2601_v53, %v621_v17 }
 0x2cd   :  { %v623_v21 = vadd.f32 %v2601_v53, %v622_v18 }
 0x2cf   :  { %v3159_v24 = vsel %vm624_vm5, %v2601_v53, %v623_v21 }
 0x345   :  { %v506_v1 = vpop.f32.mrf.mxu2 }
 0x34d   :  { %v508_v2 = vpop.f32.mrf.mxu2  ;;  %v525_v3 = vpop.f32.mrf.mxu3 }
 0x34e   :  { %v529_v4 = vpack.c.bf16 %v525_v3, %v506_v1  ;;  %v2469_v1 = vld [vmem:[%s3564_s6 + $0x20] sm:$0xff]  ;;  %v2468_v3 = vld [vmem:[%s3564_s6 + $0x18] sm:$0xff] }
 0x34f   :  { %v2477_v2 = vld [vmem:[%s3564_s6 + $0x60] sm:$0xff]  ;;  %807 = vmatpush.bf16.msra.mxu2 %v2469_v1 }
 0x350   :  { %2001 = vmatmul.msk.bf16.vlgmr.msra.gmra.mxu0 %vm415_vm0, %v529_v4  ;;  %2002 = vmatmul.msk.bf16.vlgmr.msra.gmra.mxu1 %vm415_vm0, %v529_v4  ;;  %v2476_v4 = vld [vmem:[%s3564_s6 + $0x58] sm:$0xff] }
 0x351   :  { %821 = vmatpush.bf16.msra.mxu3 %v2477_v2 }
 0x353   :  { %808 = vmatpush.bf16.msra.mxu2 %v2468_v3 }
 0x355   :  { %v527_v5 = vpop.f32.mrf.mxu3  ;;  %822 = vmatpush.bf16.msra.mxu3 %v2476_v4 }
 0x356   :  { %v142_v5 = vld [vmem:[%s3559_s1 + $0x20] sm:$0xff] }
 0x3cd   :  { %v590_v6 = vpop.f32.mrf.mxu0  ;;  %v604_v7 = vpop.f32.mrf.mxu1 }
 0x3ce   :  { %v609_v8 = vadd.f32 %v590_v6, %v3001_v47  ;;  %v610_v9 = vadd.f32 %v604_v7, %v3005_v50  ;;  %v2488_v47 = vld [vmem:[%s3565_s7 + $0x38] sm:$0xff]  ;;  %v144_v6 = vld [vmem:[%s3559_s1 + $0x30] sm:$0xff]  ;;  %v143_v7 = vld [vmem:[%s3559_s1 + $0x28] sm:$0xff] }
 0x3cf   :  { %v2496_v50 = vld [vmem:[%s3565_s7 + $0x78] sm:$0xff]  ;;  %960 = vmatpush.bf16.msrb.mxu0 %v2488_v47 }
 0x3d0   :  { %v613_v10 = vadd.f32 %v610_v9, %v609_v8  ;;  %979 = vmatpush.bf16.msrb.mxu1 %v2496_v50 }
 0x3d2   :  { %614 = vadd.xlane.f32.xlu0 %v613_v10 }
 0x3d5   :  { %v592_v11 = vpop.f32.mrf.mxu0  ;;  %v606_v12 = vpop.f32.mrf.mxu1 }
 0x3d6   :  { %v611_v13 = vadd.f32 %v592_v11, %v3003_v48  ;;  %v612_v14 = vadd.f32 %v606_v12, %v3007_v51  ;;  %v2487_v48 = vld [vmem:[%s3565_s7 + $0x30] sm:$0xff] }
 0x3d7   :  { %v2495_v51 = vld [vmem:[%s3565_s7 + $0x70] sm:$0xff]  ;;  %961 = vmatpush.bf16.msrb.mxu0 %v2487_v48 }
 0x3d8   :  { %v616_v15 = vadd.f32 %v612_v14, %v611_v13  ;;  %980 = vmatpush.bf16.msrb.mxu1 %v2495_v51  ;;  %v2467_v11 = vld [vmem:[%s3564_s6 + $0x10] sm:$0xff] }
 0x3d9   :  { %v2475_v12 = vld [vmem:[%s3564_s6 + $0x50] sm:$0xff]  ;;  %809 = vmatpush.bf16.msra.mxu2 %v2467_v11 }
 0x3da   :  { %617 = vadd.xlane.f32.xlu1 %v616_v15  ;;  %823 = vmatpush.bf16.msra.mxu3 %v2475_v12  ;;  %v2465_v15 = vld [vmem:[%s3564_s6] sm:$0xff] }
 0x3db   :  { %962 = vmatpush.bf16.msrb.mxu0 %v2486_v19 }
 0x3dc   :  { %981 = vmatpush.bf16.msrb.mxu1 %v2494_v20 }
 0x3df   :  { %963 = vmatpush.bf16.msrb.mxu0 %v2485_v22 }
 0x3e0   :  { %982 = vmatpush.bf16.msrb.mxu1 %v2493_v23 }
 0x3e3   :  { %964 = vmatpush.bf16.msrb.mxu0 %v2484_v25 }
 0x3e4   :  { %983 = vmatpush.bf16.msrb.mxu1 %v2492_v26 }
 0x3e7   :  { %965 = vmatpush.bf16.msrb.mxu0 %v2483_v31 }
 0x3e8   :  { %984 = vmatpush.bf16.msrb.mxu1 %v2491_v32 }
 0x3eb   :  { %966 = vmatpush.bf16.msrb.mxu0 %v2482_v36 }
 0x3ec   :  { %985 = vmatpush.bf16.msrb.mxu1 %v2490_v37 }
 0x3ef   :  { %967 = vmatpush.bf16.msrb.mxu0 %v2481_v45 }
 0x3f0   :  { %986 = vmatpush.bf16.msrb.mxu1 %v2489_v46 }
 0x3f2   :  { %968 = vmatmul.bf16.vlgmr.msrb.gmra.mxu0 %v672_v59 }
 0x3f3   :  { %987 = vmatmul.bf16.vlgmr.msrb.gmra.mxu1 %v673_v60 }
 0x445   :  { %v615_v27 = vpop.xlane.xlu0 %614 }
 0x446   :  { %v626_v28 = vmul.f32 %v3159_v24, %v615_v27 }
 0x448   :  { %v3168_v29 = vsub.f32 %v609_v8, %v626_v28  ;;  %v3170_v30 = vsub.f32 %v610_v9, %v626_v28  ;;  %v145_v8 = vld [vmem:[%s3559_s1 + $0x38] sm:$0xff]  ;;  %v674_v9 = vpack.c.bf16 %v144_v6, %v142_v5 }
 0x449   :  { %v675_v10 = vpack.c.bf16 %v145_v8, %v143_v7 }
 0x44a   :  { %v632_v33 = vmul.f32 %v3168_v29, %v3168_v29  ;;  %v633_v34 = vmul.f32 %v3170_v30, %v3170_v30  ;;  %973 = vmatmul.bf16.gmra.mxu0 %v674_v9 }
 0x44b   :  { %992 = vmatmul.bf16.gmra.mxu1 %v675_v10 }
 0x44c   :  { %v636_v35 = vadd.f32 %v633_v34, %v632_v33 }
 0x44d   :  { %v618_v38 = vpop.xlane.xlu1 %617 }
 0x44e   :  { %v627_v39 = vmul.f32 %v3159_v24, %v618_v38  ;;  %637 = vadd.xlane.f32.xlu2 %v636_v35 }
 0x450   :  { %v3189_v40 = vsub.f32 %v611_v13, %v627_v39  ;;  %v3191_v41 = vsub.f32 %v612_v14, %v627_v39  ;;  %v2466_v13 = vld [vmem:[%s3564_s6 + $0x8] sm:$0xff] }
 0x451   :  { %v2474_v14 = vld [vmem:[%s3564_s6 + $0x48] sm:$0xff]  ;;  %810 = vmatpush.bf16.msra.mxu2 %v2466_v13 }
 0x452   :  { %v634_v42 = vmul.f32 %v3189_v40, %v3189_v40  ;;  %v635_v43 = vmul.f32 %v3191_v41, %v3191_v41  ;;  %824 = vmatpush.bf16.msra.mxu3 %v2474_v14 }
 0x454   :  { %v639_v44 = vadd.f32 %v635_v43, %v634_v42 }
 0x455   :  { %811 = vmatpush.bf16.msra.mxu2 %v2465_v15 }
 0x456   :  { %640 = vadd.xlane.f32.xlu1 %v639_v44  ;;  %825 = vmatpush.bf16.msra.mxu3 %v2473_v52 }
 0x46f   :  { %v969_v42 = vpop.f32.mrf.mxu0 }
 0x4c1   :  { %v638_v53 = vpop.xlane.xlu2 %637 }
 0x4c2   :  { %v642_v16 = vmul.f32 %v638_v53, %v3159_v24 }
 0x4c4   :  { %v644_v47 = vadd.f32 1e-05, %v642_v16 }
 0x4c6   :  { %2602 = vrsqrt.f32 %v644_v47  ;;  %vm652_vm7 = vweird.f32 %v644_v47 }
 0x4c9   :  { %v641_v50 = vpop.xlane.xlu1 %640 }
 0x4ca   :  { %v643_v17 = vmul.f32 %v641_v50, %v3159_v24 }
 0x4cc   :  { %v2603_v48 = vpop.eup %2602  ;;  %v645_v51 = vadd.f32 1e-05, %v643_v17 }
 0x4cd   :  { %v647_v18 = vmul.f32 %v2603_v48, %v644_v47  ;;  %vm653_vm6 = vweird.f32 %v2603_v48 }
 0x4ce   :  { %2604 = vrsqrt.f32 %v645_v51  ;;  %vm654_vm9 = vmor %vm652_vm7, %vm653_vm6  ;;  %vm662_vm10 = vweird.f32 %v645_v51 }
 0x4cf   :  { %v648_v19 = vmul.f32 %v2603_v48, %v647_v18 }
 0x4d1   :  { %v649_v20 = vmul.f32 0.5, %v648_v19 }
 0x4d3   :  { %v650_v22 = vsub.f32 1.5, %v649_v20 }
 0x4d4   :  { %v2605_v21 = vpop.eup %2604 }
 0x4d5   :  { %v657_v23 = vmul.f32 %v2605_v21, %v645_v51  ;;  %v651_v26 = vmul.f32 %v2603_v48, %v650_v22  ;;  %vm663_vm8 = vweird.f32 %v2605_v21 }
 0x4d6   :  { %vm664_vm11 = vmor %vm662_vm10, %vm663_vm8 }
 0x4d7   :  { %v658_v25 = vmul.f32 %v2605_v21, %v657_v23  ;;  %v655_v31 = vsel %vm654_vm9, %v2603_v48, %v651_v26  ;;  %v2574_v48 = vld [vmem:[#allocation7] sm:$0xf]  }
 0x4d8   :  { %v3278_v34 = vmul.f32 %v655_v31, %v3168_v29  ;;  %v3284_v36 = vmul.f32 %v655_v31, %v3170_v30  ;;  %v988_v29 = vpop.f32.mrf.mxu1  ;;  %v2575_v18 = vunpack.c.0.s8 %v2574_v48  ;;  %v2576_v26 = vunpack.c.1.s8 %v2574_v48 }
 0x4d9   :  { %v659_v27 = vmul.f32 0.5, %v658_v25  ;;  %v989_v43 = vadd.f32 %v988_v29, %v969_v42 }
 0x4da   :  { %vm156_vm13 = vcmp.ne.s32.totalorder %v2575_v18, 0  ;;  %vm157_vm14 = vcmp.ne.s32.totalorder %v2576_v26, 0 }
 0x4db   :  { %v660_v28 = vsub.f32 1.5, %v659_v27  ;;  %v1000_v44 = vpack.c.bf16 %v989_v43, %v989_v43 }
 0x4dd   :  { %v661_v32 = vmul.f32 %v2605_v21, %v660_v28  ;;  %v1006_v30 = vunpack.c.l.b16 %v1000_v44 }
 0x4df   :  { %v665_v33 = vsel %vm664_vm11, %v2605_v21, %v661_v32 }
 0x4e0   :  { %v3281_v35 = vmul.f32 %v665_v33, %v3189_v40  ;;  %v3287_v37 = vmul.f32 %v665_v33, %v3191_v41  ;;  %v971_v40 = vpop.f32.mrf.mxu0  ;;  %v990_v45 = vpop.f32.mrf.mxu1 }
 0x4e1   :  { %v991_v46 = vadd.f32 %v990_v45, %v971_v40 }
 0x4e2   :  { %v670_v38 = vpack.c.bf16 %v3281_v35, %v3278_v34  ;;  %v671_v39 = vpack.c.bf16 %v3287_v37, %v3284_v36 }
 0x4e3   :  { %v1001_v49 = vpack.c.bf16 %v991_v46, %v991_v46  ;;  %v2161_v46 = vld [vmem:[#allocation10 + $0x30] sm:$0xf] }
 0x4e4   :  { %812 = vmatmul.bf16.vlgmr.msra.gmra.mxu2 %v670_v38  ;;  %826 = vmatmul.bf16.vlgmr.msra.gmra.mxu3 %v671_v39 }
 0x4e5   :  { %v1007_v54 = vunpack.c.l.b16 %v1001_v49  ;;  %v2503_v49 = vld [vmem:[#allocation10 + $0x34] sm:$0xf] }
 0x4e7   :  { %v1008_v41 = vpack.c.b16 %v1007_v54, %v1006_v30  ;;  %v2504_v30 = vld [vmem:[#allocation10 + $0x34] sm:$0xf0] }
 0x4e8   :  { %v974_v55 = vpop.f32.mrf.mxu0  ;;  %v993_v56 = vpop.f32.mrf.mxu1  ;;  %v2162_v54 = vor.u32 %v2504_v30, %v2161_v46  ;;  %v2293_v46 = vld [vmem:[%s3567_s9 + $0xf8] sm:$0xf0] }
 0x4e9   :  { %v1013_v57 = vsel %vm415_vm0, %v1008_v41, 0  ;;  %v994_v58 = vadd.f32 %v993_v56, %v974_v55  ;;  %v2153_v55 = vld [vmem:[#allocation10 + $0x20] sm:$0xf]  ;;  %v2502_v56 = vld [vmem:[#allocation10 + $0x24] sm:$0xf0] }
 0x4ea   :  { %1022 = vmatpush.bf16.xpose.msrb.mxu2 %v1013_v57  ;;  %1175 = vmatpush.bf16.msra.mxu0 %v2162_v54  ;;  %v2518_v54 = vld [vmem:[%s3567_s9 + $0x64] sm:$0xf0] }
 0x4eb   :  { %v1002_v59 = vpack.c.bf16 %v994_v58, %v994_v58  ;;  %v2501_v58 = vld [vmem:[#allocation10 + $0x24] sm:$0xf] }
 0x4ed   :  { %v1030_v63 = vunpack.c.l.b16 %v1002_v59  ;;  %v2155_v59 = vld [vmem:[#allocation10 + $0x28] sm:$0xf0] }
 0x4f0   :  { %v976_v60 = vpop.f32.mrf.mxu0  ;;  %v995_v61 = vpop.f32.mrf.mxu1 }
 0x4f1   :  { %v996_v62 = vadd.f32 %v995_v61, %v976_v60  ;;  %v2154_v60 = vor.u32 %v2502_v56, %v2153_v55  ;;  %v2158_v61 = vor.u32 %v2501_v58, %v2155_v59  ;;  %v2534_v56 = vld [vmem:[%s3567_s9 + $0xe4] sm:$0xf0]  ;;  %v2221_v58 = vld [vmem:[%s3567_s9 + $0x68] sm:$0xf0] }
 0x4f3   :  { %v1003_v0 = vpack.c.bf16 %v996_v62, %v996_v62  ;;  %v2145_v62 = vld [vmem:[#allocation10 + $0x10] sm:$0xf]  ;;  %1176 = vmatpush.bf16.msra.mxu0 %v2154_v60 }
 0x4f5   :  { %v1031_v1 = vunpack.c.l.b16 %v1003_v0  ;;  %v2499_v0 = vld [vmem:[#allocation10 + $0x14] sm:$0xf] }
 0x4f7   :  { %v1032_v2 = vpack.c.b16 %v1031_v1, %v1030_v63  ;;  %v2500_v63 = vld [vmem:[#allocation10 + $0x14] sm:$0xf0]  ;;  %v2147_v1 = vld [vmem:[#allocation10 + $0x18] sm:$0xf0] }
 0x4f9   :  { %v1037_v3 = vsel %vm415_vm0, %v1032_v2, 0 }
 0x4fa   :  { %1046 = vmatpush.bf16.xpose.msrb.mxu3 %v1037_v3  ;;  %v2150_v3 = vor.u32 %v2499_v0, %v2147_v1  ;;  %v2211_v0 = vld [vmem:[%s3567_s9 + $0x50] sm:$0xf]  ;;  %v2516_v1 = vld [vmem:[%s3567_s9 + $0x54] sm:$0xf0] }
 0x567   :  { %v813_v4 = vpop.f32.mrf.mxu2  ;;  %v827_v5 = vpop.f32.mrf.mxu3 }
 0x568   :  { %v828_v6 = vadd.f32 %v827_v5, %v813_v4  ;;  %v2137_v4 = vld [vmem:[#allocation10] sm:$0xf]  ;;  %v2498_v5 = vld [vmem:[#allocation10 + $0x4] sm:$0xf0] }
 0x56a   :  { %v998_v7 = vpack.c.bf16 %v828_v6, %v828_v6  ;;  %v2497_v6 = vld [vmem:[#allocation10 + $0x4] sm:$0xf] }
 0x56c   :  { %2131 = vmatmul.msk.bf16.vlgmr.msrb.gmra.mxu2 %vm415_vm0, %v998_v7  ;;  %v2138_v7 = vor.u32 %v2498_v5, %v2137_v4  ;;  %v2532_v4 = vld [vmem:[%s3567_s9 + $0xd4] sm:$0xf0]  ;;  %v2515_v5 = vld [vmem:[%s3567_s9 + $0x54] sm:$0xf] }
 0x56f   :  { %v815_v8 = vpop.f32.mrf.mxu2  ;;  %v829_v9 = vpop.f32.mrf.mxu3 }
 0x570   :  { %v830_v10 = vadd.f32 %v829_v9, %v815_v8  ;;  %v2139_v8 = vld [vmem:[#allocation10 + $0x8] sm:$0xf0] }
 0x571   :  { %v2142_v9 = vor.u32 %v2497_v6, %v2139_v8  ;;  %v2213_v6 = vld [vmem:[%s3567_s9 + $0x58] sm:$0xf0] }
 0x572   :  { %v999_v11 = vpack.c.bf16 %v830_v10, %v830_v10  ;;  %v2216_v8 = vor.u32 %v2515_v5, %v2213_v6  ;;  %v2522_v5 = vld [vmem:[%s3567_s9 + $0x84] sm:$0xf0]  ;;  %v2505_v6 = vld [vmem:[%s3567_s9 + $0x4] sm:$0xf] }
 0x574   :  { %2132 = vmatmul.msk.bf16.vlgmr.msrb.gmra.mxu3 %vm415_vm0, %v999_v11 }
 0x5ef   :  { %v1024_v12 = vpop.f32.mrf.mxu2 }
 0x5f0   :  { %v1052_v13 = vmul.f32 0.125, %v1024_v12 }
 0x5f2   :  { %v1055_v14 = vsel %vm1054_vm12, %v1052_v13, -inf }
 0x5f3   :  { %1056 = vmax.xlane.f32.xlu2 %v1055_v14 }
 0x5f7   :  { %v1026_v15 = vpop.f32.mrf.mxu2  ;;  %v1048_v52 = vpop.f32.mrf.mxu3 }
 0x5f8   :  { %v1053_v53 = vmul.f32 0.125, %v1048_v52 }
 0x5fa   :  { %v1058_v16 = vsel %vm1054_vm12, %v1053_v53, -inf }
 0x5fb   :  { %1059 = vmax.xlane.f32.xlu1 %v1058_v16 }
 0x5ff   :  { %v1050_v47 = vpop.f32.mrf.mxu3 }
 0x666   :  { %v1057_v50 = vpop.xlane.xlu2 %1056 }
 0x667   :  { %v1061_v17 = vsub.f32 %v1052_v13, %v1057_v50 }
 0x669   :  { %v1063_v51 = vmul.f32 1.442695, %v1061_v17 }
 0x66b   :  { %2606 = vpow2.f32 %v1063_v51 }
 0x66e   :  { %v1060_v19 = vpop.xlane.xlu1 %1059 }
 0x66f   :  { %v1062_v20 = vsub.f32 %v1053_v53, %v1060_v19 }
 0x671   :  { %v2607_v21 = vpop.eup %2606  ;;  %v1065_v22 = vmul.f32 1.442695, %v1062_v20 }
 0x672   :  { %v1067_v23 = vsel %vm156_vm13, 0.0, %v2607_v21 }
 0x673   :  { %2608 = vpow2.f32 %v1065_v22  ;;  %v1069_v25 = vsel %vm1054_vm12, %v1067_v23, 0.0 }
 0x674   :  { %1070 = vadd.xlane.f32.xlu2 %v1069_v25 }
 0x679   :  { %v2609_v27 = vpop.eup %2608 }
 0x67a   :  { %v1068_v28 = vsel %vm157_vm14, 0.0, %v2609_v27 }
 0x67b   :  { %v1072_v31 = vsel %vm1054_vm12, %v1068_v28, 0.0 }
 0x67c   :  { %1073 = vadd.xlane.f32.xlu1 %v1072_v31 }
 0x68c   :  { %1081 = vrot.lane.b32.xlu2 %v1008_v41, %s2812_s3  ;;  %v2163_v41 = vld [vmem:[#allocation10 + $0x38] sm:$0xf0] }
 0x68d   :  { %v2166_v57 = vor.u32 %v2503_v49, %v2163_v41  ;;  %v2219_v49 = vld [vmem:[%s3567_s9 + $0x60] sm:$0xf] }
 0x68e   :  { %v2283_v41 = vld [vmem:[%s3567_s9 + $0xe0] sm:$0xf]  ;;  %v2220_v55 = vor.u32 %v2518_v54, %v2219_v49  ;;  %v2179_v54 = vld [vmem:[%s3567_s9 + $0x10] sm:$0xf] }
 0x68f   :  { %1189 = vmatpush.bf16.msra.mxu1 %v2166_v57  ;;  %v2517_v57 = vld [vmem:[%s3567_s9 + $0x64] sm:$0xf]  ;;  %v2284_v59 = vor.u32 %v2534_v56, %v2283_v41  ;;  %v2508_v41 = vld [vmem:[%s3567_s9 + $0x14] sm:$0xf0] }
 0x690   :  { %v2224_v60 = vor.u32 %v2517_v57, %v2221_v58  ;;  %v2180_v56 = vor.u32 %v2508_v41, %v2179_v54  ;;  %v2524_v57 = vld [vmem:[%s3567_s9 + $0x94] sm:$0xf0]  ;;  %v2507_v58 = vld [vmem:[%s3567_s9 + $0x14] sm:$0xf]  ;;  %v2395_v41 = vld [vmem:[#allocation11 + $0xc0] sm:$0xf] }
 0x693   :  { %1190 = vmatpush.bf16.msra.mxu1 %v2158_v61  ;;  %v2533_v61 = vld [vmem:[%s3567_s9 + $0xe4] sm:$0xf] }
 0x695   :  { %1100 = vrot.lane.b32.xlu1 %v1032_v2, %s2812_s3  ;;  %v2146_v2 = vor.u32 %v2500_v63, %v2145_v62  ;;  %v2285_v62 = vld [vmem:[%s3567_s9 + $0xe8] sm:$0xf0] }
 0x696   :  { %v2288_v63 = vor.u32 %v2533_v61, %v2285_v62  ;;  %v2523_v62 = vld [vmem:[%s3567_s9 + $0x94] sm:$0xf] }
 0x697   :  { %1177 = vmatpush.bf16.msra.mxu0 %v2146_v2  ;;  %1191 = vmatpush.bf16.msra.mxu1 %v2150_v3  ;;  %v2275_v2 = vld [vmem:[%s3567_s9 + $0xd0] sm:$0xf]  ;;  %v2212_v3 = vor.u32 %v2516_v1, %v2211_v0  ;;  %v2171_v1 = vld [vmem:[%s3567_s9] sm:$0xf] }
 0x69b   :  { %1178 = vmatpush.bf16.msra.mxu0 %v2138_v7  ;;  %1192 = vmatpush.bf16.msra.mxu1 %v2142_v9  ;;  %v2276_v7 = vor.u32 %v2532_v4, %v2275_v2  ;;  %v2531_v9 = vld [vmem:[%s3567_s9 + $0xd4] sm:$0xf]  ;;  %v2506_v2 = vld [vmem:[%s3567_s9 + $0x4] sm:$0xf0] }
 0x69c   :  { %v2172_v4 = vor.u32 %v2506_v2, %v2171_v1 }
 0x6e7   :  { %v1071_v32 = vpop.xlane.xlu2 %1070 }
 0x6e8   :  { %2610 = vrcp.f32 %v1071_v32  ;;  %v2227_v32 = vld [vmem:[%s3567_s9 + $0x70] sm:$0xf] }
 0x6ee   :  { %v2611_v33 = vpop.eup %2610 }
 0x6ef   :  { %v1077_v38 = vmul.f32 %v2611_v33, %v1067_v23  ;;  %v1082_v39 = vpop.permute.xlu2 %1081  ;;  %v1074_v29 = vpop.xlane.xlu1 %1073  ;;  %v2520_v33 = vld [vmem:[%s3567_s9 + $0x74] sm:$0xf0] }
 0x6f0   :  { %1094 = vmatpush.bf16.msra.mxu2 %v1082_v39  ;;  %2612 = vrcp.f32 %v1074_v29  ;;  %v2228_v39 = vor.u32 %v2520_v33, %v2227_v32  ;;  %v2519_v29 = vld [vmem:[%s3567_s9 + $0x74] sm:$0xf]  ;;  %v2187_v33 = vld [vmem:[%s3567_s9 + $0x20] sm:$0xf] }
 0x6f1   :  { %v1079_v42 = vpack.c.bf16 %v1077_v38, %v1077_v38  ;;  %v2291_v38 = vld [vmem:[%s3567_s9 + $0xf0] sm:$0xf] }
 0x6f3   :  { %2133 = vmatmul.msk.bf16.vlgmr.msra.gmra.mxu2 %vm1054_vm12, %v1079_v42  ;;  %v2536_v42 = vld [vmem:[%s3567_s9 + $0xf4] sm:$0xf0] }
 0x6f4   :  { %1447 = vmatpush.bf16.msrb.mxu2 %v2228_v39  ;;  %v2251_v39 = vld [vmem:[%s3567_s9 + $0xa0] sm:$0xf] }
 0x6f6   :  { %v2613_v43 = vpop.eup %2612 }
 0x6f7   :  { %v1078_v44 = vmul.f32 %v2613_v43, %v1068_v28  ;;  %v2229_v43 = vld [vmem:[%s3567_s9 + $0x78] sm:$0xf0] }
 0x6f8   :  { %1448 = vmatpush.bf16.msrb.mxu2 %v2220_v55  ;;  %v2243_v55 = vld [vmem:[%s3567_s9 + $0x90] sm:$0xf] }
 0x6f9   :  { %v1080_v45 = vpack.c.bf16 %v1078_v44, %v1078_v44  ;;  %v2292_v44 = vor.u32 %v2536_v42, %v2291_v38  ;;  %v2510_v38 = vld [vmem:[%s3567_s9 + $0x24] sm:$0xf0] }
 0x6fa   :  { %v2188_v42 = vor.u32 %v2510_v38, %v2187_v33  ;;  %v2564_v33 = vld [vmem:[#allocation11 + $0xd4] sm:$0xf0]  ;;  %v2563_v38 = vld [vmem:[#allocation11 + $0xd4] sm:$0xf] }
 0x6fc   :  { %1449 = vmatpush.bf16.msrb.mxu2 %v2212_v3  ;;  %v2235_v3 = vld [vmem:[%s3567_s9 + $0x80] sm:$0xf] }
 0x707   :  { %v1101_v40 = vpop.permute.xlu1 %1100 }
 0x708   :  { %1113 = vmatpush.bf16.msra.mxu3 %v1101_v40  ;;  %v2232_v40 = vor.u32 %v2519_v29, %v2229_v43  ;;  %v2526_v29 = vld [vmem:[%s3567_s9 + $0xa4] sm:$0xf0]  ;;  %v2509_v43 = vld [vmem:[%s3567_s9 + $0x24] sm:$0xf] }
 0x70a   :  { %1475 = vmatpush.bf16.msrb.mxu0 %v2232_v40  ;;  %v2252_v40 = vor.u32 %v2526_v29, %v2251_v39  ;;  %v2347_v29 = vld [vmem:[#allocation11 + $0x60] sm:$0xf] }
 0x70b   :  { %2134 = vmatmul.msk.bf16.vlgmr.msra.gmra.mxu3 %vm1054_vm12, %v1080_v45  ;;  %v2535_v45 = vld [vmem:[%s3567_s9 + $0xf4] sm:$0xf] }
 0x70c   :  { %v2296_v30 = vor.u32 %v2535_v45, %v2293_v46  ;;  %1461 = vmatpush.bf16.msrb.mxu3 %v2292_v44  ;;  %v2189_v44 = vld [vmem:[%s3567_s9 + $0x28] sm:$0xf0]  ;;  %v2525_v46 = vld [vmem:[%s3567_s9 + $0xa4] sm:$0xf] }
 0x70d   :  { %v2192_v45 = vor.u32 %v2509_v43, %v2189_v44  ;;  %v2550_v43 = vld [vmem:[#allocation11 + $0x64] sm:$0xf0] }
 0x70e   :  { %1489 = vmatpush.bf16.msrb.mxu1 %v2296_v30  ;;  %1476 = vmatpush.bf16.msrb.mxu0 %v2224_v60  ;;  %v2253_v30 = vld [vmem:[%s3567_s9 + $0xa8] sm:$0xf0]  ;;  %v2244_v60 = vor.u32 %v2524_v57, %v2243_v55  ;;  %v2348_v44 = vor.u32 %v2550_v43, %v2347_v29  ;;  %v2562_v55 = vld [vmem:[#allocation11 + $0xc4] sm:$0xf0]  ;;  %v2325_v29 = vld [vmem:[#allocation11 + $0x38] sm:$0xf0] }
 0x70f   :  { %v2256_v49 = vor.u32 %v2525_v46, %v2253_v30 }
 0x710   :  { %1462 = vmatpush.bf16.msrb.mxu3 %v2284_v59  ;;  %v2181_v59 = vld [vmem:[%s3567_s9 + $0x18] sm:$0xf0] }
 0x711   :  { %v2184_v61 = vor.u32 %v2507_v58, %v2181_v59  ;;  %v2561_v58 = vld [vmem:[#allocation11 + $0xc4] sm:$0xf]  ;;  %v2339_v59 = vld [vmem:[#allocation11 + $0x50] sm:$0xf] }
 0x712   :  { %1490 = vmatpush.bf16.msrb.mxu1 %v2288_v63  ;;  %1477 = vmatpush.bf16.msrb.mxu0 %v2216_v8  ;;  %v2245_v63 = vld [vmem:[%s3567_s9 + $0x98] sm:$0xf0]  ;;  %v2236_v8 = vor.u32 %v2522_v5, %v2235_v3  ;;  %v2396_v3 = vor.u32 %v2562_v55, %v2395_v41  ;;  %v2542_v41 = vld [vmem:[#allocation11 + $0x24] sm:$0xf0]  ;;  %v2541_v55 = vld [vmem:[#allocation11 + $0x24] sm:$0xf] }
 0x713   :  { %v2248_v0 = vor.u32 %v2523_v62, %v2245_v63  ;;  %v2547_v62 = vld [vmem:[#allocation11 + $0x54] sm:$0xf]  ;;  %v2341_v63 = vld [vmem:[#allocation11 + $0x58] sm:$0xf0] }
 0x714   :  { %1463 = vmatpush.bf16.msrb.mxu3 %v2276_v7  ;;  %v2173_v7 = vld [vmem:[%s3567_s9 + $0x8] sm:$0xf0]  ;;  %v2344_v2 = vor.u32 %v2547_v62, %v2341_v63  ;;  %v2365_v63 = vld [vmem:[#allocation11 + $0x88] sm:$0xf0] }
 0x776   :  { %v1096_v10 = vpop.f32.mrf.mxu2 }
 0x77e   :  { %v1098_v11 = vpop.f32.mrf.mxu2 }
 0x78e   :  { %v1115_v12 = vpop.f32.mrf.mxu3 }
 0x78f   :  { %v1119_v13 = vpack.c.bf16 %v1115_v12, %v1096_v10  ;;  %v2277_v10 = vld [vmem:[%s3567_s9 + $0xd8] sm:$0xf0]  ;;  %v2203_v12 = vld [vmem:[%s3567_s9 + $0x40] sm:$0xf] }
 0x790   :  { %v2280_v11 = vor.u32 %v2531_v9, %v2277_v10  ;;  %v2176_v9 = vor.u32 %v2505_v6, %v2173_v7  ;;  %v2521_v10 = vld [vmem:[%s3567_s9 + $0x84] sm:$0xf] }
 0x791   :  { %2167 = vmatmul.msk.bf16.vlgmr.msra.gmra.mxu0 %vm415_vm0, %v1119_v13  ;;  %2168 = vmatmul.msk.bf16.vlgmr.msra.gmra.mxu1 %vm415_vm0, %v1119_v13  ;;  %v2514_v13 = vld [vmem:[%s3567_s9 + $0x44] sm:$0xf0] }
 0x792   :  { %1491 = vmatpush.bf16.msrb.mxu1 %v2280_v11  ;;  %v2237_v11 = vld [vmem:[%s3567_s9 + $0x88] sm:$0xf0] }
 0x796   :  { %v1117_v14 = vpop.f32.mrf.mxu3 }
 0x797   :  { %v2267_v14 = vld [vmem:[%s3567_s9 + $0xc0] sm:$0xf] }
 0x80e   :  { %v1180_v15 = vpop.f32.mrf.mxu0  ;;  %v1194_v52 = vpop.f32.mrf.mxu1 }
 0x80f   :  { %v1199_v53 = vadd.f32 %v1180_v15, %v3278_v34  ;;  %v1200_v16 = vadd.f32 %v1194_v52, %v3284_v36  ;;  %v2204_v15 = vor.u32 %v2514_v13, %v2203_v12  ;;  %v2530_v52 = vld [vmem:[%s3567_s9 + $0xc4] sm:$0xf0]  ;;  %v2240_v13 = vor.u32 %v2521_v10, %v2237_v11 }
 0x811   :  { %v1203_v47 = vadd.f32 %v1200_v16, %v1199_v53  ;;  %1450 = vmatpush.bf16.msrb.mxu2 %v2204_v15 }
 0x813   :  { %1204 = vadd.xlane.f32.xlu0 %v1203_v47  ;;  %v2268_v47 = vor.u32 %v2530_v52, %v2267_v14  ;;  %v2419_v52 = vld [vmem:[#allocation11 + $0xf0] sm:$0xf] }
 0x815   :  { %1464 = vmatpush.bf16.msrb.mxu3 %v2268_v47 }
 0x816   :  { %v1182_v50 = vpop.f32.mrf.mxu0  ;;  %v1196_v17 = vpop.f32.mrf.mxu1 }
 0x817   :  { %v1201_v48 = vadd.f32 %v1182_v50, %v3281_v35  ;;  %v1202_v51 = vadd.f32 %v1196_v17, %v3287_v37  ;;  %v2529_v17 = vld [vmem:[%s3567_s9 + $0xc4] sm:$0xf] }
 0x819   :  { %v1206_v18 = vadd.f32 %v1202_v51, %v1201_v48 }
 0x81b   :  { %1207 = vadd.xlane.f32.xlu2 %v1206_v18  ;;  %v2195_v18 = vld [vmem:[%s3567_s9 + $0x30] sm:$0xf] }
 0x886   :  { %v1205_v19 = vpop.xlane.xlu0 %1204 }
 0x887   :  { %v1209_v20 = vmul.f32 %v1205_v19, %v3159_v24  ;;  %v2512_v19 = vld [vmem:[%s3567_s9 + $0x34] sm:$0xf0] }
 0x889   :  { %v3312_v21 = vsub.f32 %v1199_v53, %v1209_v20  ;;  %v3314_v22 = vsub.f32 %v1200_v16, %v1209_v20  ;;  %v2513_v53 = vld [vmem:[%s3567_s9 + $0x44] sm:$0xf]  ;;  %v2205_v16 = vld [vmem:[%s3567_s9 + $0x48] sm:$0xf0]  ;;  %v2259_v20 = vld [vmem:[%s3567_s9 + $0xb0] sm:$0xf] }
 0x88a   :  { %v2208_v50 = vor.u32 %v2513_v53, %v2205_v16  ;;  %v2568_v53 = vld [vmem:[#allocation11 + $0xf4] sm:$0xf0]  ;;  %v2567_v16 = vld [vmem:[#allocation11 + $0xf4] sm:$0xf] }
 0x88b   :  { %v1215_v34 = vmul.f32 %v3312_v21, %v3312_v21  ;;  %v1216_v36 = vmul.f32 %v3314_v22, %v3314_v22  ;;  %v2420_v47 = vor.u32 %v2568_v53, %v2419_v52 }
 0x88c   :  { %1478 = vmatpush.bf16.msrb.mxu0 %v2208_v50  ;;  %v2421_v50 = vld [vmem:[#allocation11 + $0xf8] sm:$0xf0] }
 0x88d   :  { %v1219_v23 = vadd.f32 %v1216_v36, %v1215_v34  ;;  %v2196_v34 = vor.u32 %v2512_v19, %v2195_v18  ;;  %v2528_v36 = vld [vmem:[%s3567_s9 + $0xb4] sm:$0xf0]  ;;  %v2565_v18 = vld [vmem:[#allocation11 + $0xe4] sm:$0xf]  ;;  %v2413_v19 = vld [vmem:[#allocation11 + $0xe8] sm:$0xf0] }
 0x88e   :  { %v1208_v25 = vpop.xlane.xlu2 %1207 }
 0x88f   :  { %v1210_v35 = vmul.f32 %v1208_v25, %v3159_v24  ;;  %1220 = vadd.xlane.f32.xlu0 %v1219_v23  ;;  %v2511_v23 = vld [vmem:[%s3567_s9 + $0x34] sm:$0xf]  ;;  %v2197_v25 = vld [vmem:[%s3567_s9 + $0x38] sm:$0xf0]  ;;  %1451 = vmatpush.bf16.msrb.mxu2 %v2196_v34 }
 0x891   :  { %v3321_v37 = vsub.f32 %v1201_v48, %v1210_v35  ;;  %v3323_v26 = vsub.f32 %v1202_v51, %v1210_v35  ;;  %v2269_v48 = vld [vmem:[%s3567_s9 + $0xc8] sm:$0xf0]  ;;  %v2260_v35 = vor.u32 %v2528_v36, %v2259_v20  ;;  %v2355_v20 = vld [vmem:[#allocation11 + $0x70] sm:$0xf]  ;;  %v2552_v36 = vld [vmem:[#allocation11 + $0x74] sm:$0xf0] }
 0x892   :  { %v2272_v51 = vor.u32 %v2529_v17, %v2269_v48  ;;  %v2411_v17 = vld [vmem:[#allocation11 + $0xe0] sm:$0xf]  ;;  %v2566_v48 = vld [vmem:[#allocation11 + $0xe4] sm:$0xf0] }
 0x893   :  { %v1217_v27 = vmul.f32 %v3321_v37, %v3321_v37  ;;  %v1218_v28 = vmul.f32 %v3323_v26, %v3323_v26  ;;  %1465 = vmatpush.bf16.msrb.mxu3 %v2260_v35  ;;  %1452 = vmatpush.bf16.msrb.mxu2 %v2188_v42  ;;  %v2412_v34 = vor.u32 %v2566_v48, %v2411_v17  ;;  %v2405_v42 = vld [vmem:[#allocation11 + $0xd8] sm:$0xf0]  ;;  %v2560_v48 = vld [vmem:[#allocation11 + $0xb4] sm:$0xf0] }
 0x894   :  { %1492 = vmatpush.bf16.msrb.mxu1 %v2272_v51  ;;  %v2424_v51 = vor.u32 %v2567_v16, %v2421_v50  ;;  %v2408_v57 = vor.u32 %v2563_v38, %v2405_v42  ;;  %v2544_v38 = vld [vmem:[#allocation11 + $0x34] sm:$0xf0] }
 0x895   :  { %v1222_v31 = vadd.f32 %v1218_v28, %v1217_v27  ;;  %v2200_v27 = vor.u32 %v2511_v23, %v2197_v25  ;;  %v2527_v28 = vld [vmem:[%s3567_s9 + $0xb4] sm:$0xf]  ;;  %v2551_v23 = vld [vmem:[#allocation11 + $0x74] sm:$0xf]  ;;  %v2357_v25 = vld [vmem:[#allocation11 + $0x78] sm:$0xf0] }
 0x897   :  { %1223 = vadd.xlane.f32.xlu1 %v1222_v31  ;;  %v2261_v31 = vld [vmem:[%s3567_s9 + $0xb8] sm:$0xf0]  ;;  %1479 = vmatpush.bf16.msrb.mxu0 %v2200_v27  ;;  %v2416_v27 = vor.u32 %v2565_v18, %v2413_v19  ;;  %v2389_v18 = vld [vmem:[#allocation11 + $0xb8] sm:$0xf0]  ;;  %v2331_v19 = vld [vmem:[#allocation11 + $0x40] sm:$0xf] }
 0x898   :  { %v2264_v32 = vor.u32 %v2527_v28, %v2261_v31  ;;  %1466 = vmatpush.bf16.msrb.mxu3 %v2252_v40  ;;  %1453 = vmatpush.bf16.msrb.mxu2 %v2180_v56  ;;  %v2356_v28 = vor.u32 %v2552_v36, %v2355_v20  ;;  %v2360_v31 = vor.u32 %v2551_v23, %v2357_v25  ;;  %v2549_v40 = vld [vmem:[#allocation11 + $0x64] sm:$0xf]  ;;  %v2546_v20 = vld [vmem:[#allocation11 + $0x44] sm:$0xf0]  ;;  %v2333_v36 = vld [vmem:[#allocation11 + $0x48] sm:$0xf0] }
 0x899   :  { %v2379_v25 = vld [vmem:[#allocation11 + $0xa0] sm:$0xf]  ;;  %s2814_s9 = smov [#allocation13]  }
 0x89a   :  { %1493 = vmatpush.bf16.msrb.mxu1 %v2264_v32  ;;  %v2403_v32 = vld [vmem:[#allocation11 + $0xd0] sm:$0xf]  ;;  %s1819_s27 = sshll.u32 %s2814_s9, 4  ;;  %s1820_s27 = int_to_ptr.vmem [resolvable:$true] %s1819_s27 }
 0x89b   :  { %1480 = vmatpush.bf16.msrb.mxu0 %v2192_v45  ;;  %v2349_v45 = vld [vmem:[#allocation11 + $0x68] sm:$0xf0] }
 0x89c   :  { %1467 = vmatpush.bf16.msrb.mxu3 %v2244_v60  ;;  %1454 = vmatpush.bf16.msrb.mxu2 %v2172_v4  ;;  %v2352_v54 = vor.u32 %v2549_v40, %v2349_v45  ;;  %v2548_v60 = vld [vmem:[#allocation11 + $0x54] sm:$0xf0]  ;;  %v2555_v45 = vld [vmem:[#allocation11 + $0x94] sm:$0xf] }
 0x89d   :  { %v2340_v1 = vor.u32 %v2548_v60, %v2339_v59  ;;  %v2556_v40 = vld [vmem:[#allocation11 + $0x94] sm:$0xf0]  ;;  %v2363_v59 = vld [vmem:[#allocation11 + $0x80] sm:$0xf]  ;;  %v2554_v60 = vld [vmem:[#allocation11 + $0x84] sm:$0xf0] }
 0x89e   :  { %1494 = vmatpush.bf16.msrb.mxu1 %v2256_v49  ;;  %v2404_v49 = vor.u32 %v2564_v33, %v2403_v32  ;;  %v2323_v33 = vld [vmem:[#allocation11 + $0x30] sm:$0xf]  ;;  %v2364_v62 = vor.u32 %v2554_v60, %v2363_v59 }
 0x89f   :  { %1481 = vmatpush.bf16.msrb.mxu0 %v2184_v61  ;;  %v2397_v61 = vld [vmem:[#allocation11 + $0xc8] sm:$0xf0]  ;;  %v2324_v42 = vor.u32 %v2544_v38, %v2323_v33 }
 0x8a0   :  { %1468 = vmatpush.bf16.msrb.mxu3 %v2236_v8  ;;  %1701 = vmatpush.bf16.msra.mxu2 %v2356_v28  ;;  %v2400_v5 = vor.u32 %v2561_v58, %v2397_v61  ;;  %v2553_v61 = vld [vmem:[#allocation11 + $0x84] sm:$0xf] }
 0x8a2   :  { %1495 = vmatpush.bf16.msrb.mxu1 %v2248_v0 }
 0x8a3   :  { %1482 = vmatpush.bf16.msrb.mxu0 %v2176_v9 }
 0x8a4   :  { %1715 = vmatpush.bf16.msra.mxu3 %v2420_v47  ;;  %1702 = vmatpush.bf16.msra.mxu2 %v2348_v44  ;;  %v2371_v44 = vld [vmem:[#allocation11 + $0x90] sm:$0xf] }
 0x8a6   :  { %1496 = vmatpush.bf16.msrb.mxu1 %v2240_v13 }
 0x8a7   :  { %1729 = vmatpush.bf16.msra.mxu0 %v2360_v31  ;;  %v2381_v31 = vld [vmem:[#allocation11 + $0xa8] sm:$0xf0] }
 0x8a8   :  { %1716 = vmatpush.bf16.msra.mxu3 %v2412_v34  ;;  %1703 = vmatpush.bf16.msra.mxu2 %v2340_v1  ;;  %v2332_v34 = vor.u32 %v2546_v20, %v2331_v19  ;;  %v2307_v1 = vld [vmem:[#allocation11 + $0x10] sm:$0xf] }
 0x8aa   :  { %1743 = vmatpush.bf16.msra.mxu1 %v2424_v51 }
 0x8ab   :  { %1730 = vmatpush.bf16.msra.mxu0 %v2352_v54  ;;  %v2315_v54 = vld [vmem:[#allocation11 + $0x20] sm:$0xf] }
 0x8ac   :  { %1717 = vmatpush.bf16.msra.mxu3 %v2404_v49  ;;  %1704 = vmatpush.bf16.msra.mxu2 %v2332_v34 }
 0x8ae   :  { %1744 = vmatpush.bf16.msra.mxu1 %v2416_v27  ;;  %v2557_v27 = vld [vmem:[#allocation11 + $0xa4] sm:$0xf] }
 0x8af   :  { %1731 = vmatpush.bf16.msra.mxu0 %v2344_v2  ;;  %v2384_v32 = vor.u32 %v2557_v27, %v2381_v31  ;;  %v2540_v2 = vld [vmem:[#allocation11 + $0x14] sm:$0xf0] }
 0x8b0   :  { %1718 = vmatpush.bf16.msra.mxu3 %v2396_v3  ;;  %1705 = vmatpush.bf16.msra.mxu2 %v2324_v42  ;;  %v2539_v3 = vld [vmem:[#allocation11 + $0x14] sm:$0xf] }
 0x8b2   :  { %1745 = vmatpush.bf16.msra.mxu1 %v2408_v57  ;;  %v2317_v57 = vld [vmem:[#allocation11 + $0x28] sm:$0xf0] }
 0x8b3   :  { %v2320_v58 = vor.u32 %v2541_v55, %v2317_v57 }
 0x8b6   :  { %1746 = vmatpush.bf16.msra.mxu1 %v2400_v5  ;;  %v2309_v5 = vld [vmem:[#allocation11 + $0x18] sm:$0xf0] }
 0x902   :  { %v1221_v12 = vpop.xlane.xlu0 %1220 }
 0x903   :  { %v1225_v14 = vmul.f32 %v1221_v12, %v3159_v24 }
 0x905   :  { %v3522_v15 = vadd.f32 1e-05, %v1225_v14 }
 0x907   :  { %2614 = vrsqrt.f32 %v3522_v15  ;;  %vm1235_vm0 = vweird.f32 %v3522_v15 }
 0x90a   :  { %v1224_v35 = vpop.xlane.xlu1 %1223 }
 0x90b   :  { %v1226_v39 = vmul.f32 %v1224_v35, %v3159_v24  ;;  %v2558_v35 = vld [vmem:[#allocation11 + $0xa4] sm:$0xf0] }
 0x90c   :  { %v2380_v28 = vor.u32 %v2558_v35, %v2379_v25 }
 0x90d   :  { %v2615_v46 = vpop.eup %2614  ;;  %v1228_v30 = vadd.f32 1e-05, %v1226_v39  ;;  %v2543_v39 = vld [vmem:[#allocation11 + $0x34] sm:$0xf] }
 0x90e   :  { %v1230_v56 = vmul.f32 %v2615_v46, %v3522_v15  ;;  %vm1236_vm15 = vweird.f32 %v2615_v46  ;;  %v2328_v43 = vor.u32 %v2543_v39, %v2325_v29 }
 0x90f   :  { %2616 = vrsqrt.f32 %v1228_v30  ;;  %vm1237_vm2 = vmor %vm1235_vm0, %vm1236_vm15  ;;  %vm1245_vm3 = vweird.f32 %v1228_v30 }
 0x910   :  { %v1231_v0 = vmul.f32 %v2615_v46, %v1230_v56  ;;  %v2316_v56 = vor.u32 %v2542_v41, %v2315_v54 }
 0x912   :  { %v1232_v4 = vmul.f32 0.5, %v1231_v0  ;;  %1706 = vmatpush.bf16.msra.mxu2 %v2316_v56  ;;  %v2368_v0 = vor.u32 %v2553_v61, %v2365_v63 }
 0x914   :  { %v1233_v7 = vsub.f32 1.5, %v1232_v4  ;;  %v2308_v4 = vor.u32 %v2540_v2, %v2307_v1 }
 0x915   :  { %v2617_v6 = vpop.eup %2616 }
 0x916   :  { %v1240_v8 = vmul.f32 %v2617_v6, %v1228_v30  ;;  %v1234_v10 = vmul.f32 %v2615_v46, %v1233_v7  ;;  %vm1246_vm1 = vweird.f32 %v2617_v6  ;;  %v2373_v30 = vld [vmem:[#allocation11 + $0x98] sm:$0xf0]  ;;  %1707 = vmatpush.bf16.msra.mxu2 %v2308_v4  ;;  %v2299_v7 = vld [vmem:[#allocation11] sm:$0xf] }
 0x917   :  { %vm1247_vm4 = vmor %vm1245_vm3, %vm1246_vm1  ;;  %v2376_v49 = vor.u32 %v2555_v45, %v2373_v30 }
 0x918   :  { %v1241_v9 = vmul.f32 %v2617_v6, %v1240_v8  ;;  %v1238_v13 = vsel %vm1237_vm2, %v2615_v46, %v1234_v10  ;;  %v2372_v46 = vor.u32 %v2556_v40, %v2371_v44  ;;  %v2538_v8 = vld [vmem:[#allocation11 + $0x4] sm:$0xf0] }
 0x919   :  { %v3529_v53 = vmul.f32 %v1238_v13, %v3312_v21  ;;  %v3535_v47 = vmul.f32 %v1238_v13, %v3314_v22  ;;  %v2387_v21 = vld [vmem:[#allocation11 + $0xb0] sm:$0xf]  ;;  %v2300_v10 = vor.u32 %v2538_v8, %v2299_v7 }
 0x91a   :  { %v1242_v11 = vmul.f32 0.5, %v1241_v9  ;;  %v2388_v51 = vor.u32 %v2560_v48, %v2387_v21  ;;  %v2537_v9 = vld [vmem:[#allocation11 + $0x4] sm:$0xf] }
 0x91b   :  { %1708 = vmatpush.bf16.msra.mxu2 %v2300_v10 }
 0x91c   :  { %v1243_v12 = vsub.f32 1.5, %v1242_v11  ;;  %1719 = vmatpush.bf16.msra.mxu3 %v2388_v51  ;;  %v2301_v11 = vld [vmem:[#allocation11 + $0x8] sm:$0xf0] }
 0x91e   :  { %v1244_v14 = vmul.f32 %v2617_v6, %v1243_v12  ;;  %v2304_v12 = vor.u32 %v2537_v9, %v2301_v11 }
 0x920   :  { %v1248_v52 = vsel %vm1247_vm4, %v2617_v6, %v1244_v14  ;;  %1720 = vmatpush.bf16.msra.mxu3 %v2380_v28  ;;  %v2312_v6 = vor.u32 %v2539_v3, %v2309_v5 }
 0x921   :  { %v3532_v16 = vmul.f32 %v1248_v52, %v3321_v37  ;;  %v3538_v50 = vmul.f32 %v1248_v52, %v3323_v26  ;;  %v2559_v37 = vld [vmem:[#allocation11 + $0xb4] sm:$0xf]  ;;  %v2545_v26 = vld [vmem:[#allocation11 + $0x44] sm:$0xf] }
 0x922   :  { %v2392_v22 = vor.u32 %v2559_v37, %v2389_v18  ;;  %v2336_v23 = vor.u32 %v2545_v26, %v2333_v36 }
 0x923   :  { %v1253_v15 = vpack.c.bf16 %v3532_v16, %v3529_v53  ;;  %v1254_v17 = vpack.c.bf16 %v3538_v50, %v3535_v47 }
 0x924   :  { %1747 = vmatpush.bf16.msra.mxu1 %v2392_v22  ;;  %1732 = vmatpush.bf16.msra.mxu0 %v2336_v23 }
 0x925   :  { %1455 = vmatmul.bf16.vlgmr.msrb.gmra.mxu2 %v1253_v15  ;;  %1469 = vmatmul.bf16.vlgmr.msrb.gmra.mxu3 %v1254_v17 }
 0x926   :  { %1483 = vmatmul.bf16.vlgmr.msrb.gmra.mxu0 %v1253_v15  ;;  %1497 = vmatmul.bf16.vlgmr.msrb.gmra.mxu1 %v1254_v17 }
 0x927   :  { %1721 = vmatpush.bf16.msra.mxu3 %v2372_v46 }
 0x928   :  { %1748 = vmatpush.bf16.msra.mxu1 %v2384_v32  ;;  %1733 = vmatpush.bf16.msra.mxu0 %v2328_v43 }
 0x92b   :  { %1722 = vmatpush.bf16.msra.mxu3 %v2364_v62 }
 0x92c   :  { %1749 = vmatpush.bf16.msra.mxu1 %v2376_v49  ;;  %1734 = vmatpush.bf16.msra.mxu0 %v2320_v58 }
 0x930   :  { %1750 = vmatpush.bf16.msra.mxu1 %v2368_v0  ;;  %1735 = vmatpush.bf16.msra.mxu0 %v2312_v6 }
 0x934   :  { %1736 = vmatpush.bf16.msra.mxu0 %v2304_v12 }
 0x9a3   :  { %v1484_v13 = vpop.f32.mrf.mxu0  ;;  %v1498_v14 = vpop.f32.mrf.mxu1 }
 0x9a4   :  { %v1499_v17 = vadd.f32 %v1498_v14, %v1484_v13 }
 0x9a6   :  { %v1504_v51 = vmax.f32 %v1499_v17, 0.0 }
 0x9a8   :  { %v1456_v52 = vpop.f32.mrf.mxu2  ;;  %v1470_v15 = vpop.f32.mrf.mxu3 }
 0x9a9   :  { %v1471_v22 = vadd.f32 %v1470_v15, %v1456_v52 }
 0x9ab   :  { %v1486_v21 = vpop.f32.mrf.mxu0  ;;  %v1500_v48 = vpop.f32.mrf.mxu1  ;;  %v1503_v36 = vmax.f32 %v1471_v22, 0.0 }
 0x9ac   :  { %v1501_v37 = vadd.f32 %v1500_v48, %v1486_v21 }
 0x9ae   :  { %v1506_v18 = vmax.f32 %v1501_v37, 0.0 }
 0x9b0   :  { %v1508_v19 = vpack.c.bf16 %v1506_v18, %v1504_v51  ;;  %v1458_v20 = vpop.f32.mrf.mxu2  ;;  %v1472_v26 = vpop.f32.mrf.mxu3 }
 0x9b1   :  { %v1473_v34 = vadd.f32 %v1472_v26, %v1458_v20 }
 0x9b2   :  { %1723 = vmatmul.bf16.vlgmr.msra.gmra.mxu3 %v1508_v19  ;;  %1751 = vmatmul.bf16.vlgmr.msra.gmra.mxu1 %v1508_v19 }
 0x9b3   :  { %v1505_v23 = vmax.f32 %v1473_v34, 0.0 }
 0x9b5   :  { %v1507_v25 = vpack.c.bf16 %v1505_v23, %v1503_v36 }
 0x9b7   :  { %1709 = vmatmul.bf16.vlgmr.msra.gmra.mxu2 %v1507_v25  ;;  %1737 = vmatmul.bf16.vlgmr.msra.gmra.mxu0 %v1507_v25 }
 0xa2f   :  { %v1752_v27 = vpop.f32.mrf.mxu1 }
 0xa34   :  { %v1738_v35 = vpop.f32.mrf.mxu0 }
 0xa35   :  { %v1724_v28 = vpop.f32.mrf.mxu3  ;;  %v1753_v31 = vadd.f32 %v1752_v27, %v1738_v35 }
 0xa37   :  { %v1758_v38 = vadd.f32 %v1753_v31, %v3535_v47  ;;  %v1754_v43 = vpop.f32.mrf.mxu1 }
 0xa3a   :  { %v1710_v32 = vpop.f32.mrf.mxu2 }
 0xa3b   :  { %v1725_v33 = vadd.f32 %v1724_v28, %v1710_v32 }
 0xa3c   :  { %v1740_v42 = vpop.f32.mrf.mxu0 }
 0xa3d   :  { %v1757_v39 = vadd.f32 %v1725_v33, %v3529_v53  ;;  %v1755_v44 = vadd.f32 %v1754_v43, %v1740_v42  ;;  %v1726_v40 = vpop.f32.mrf.mxu3 }
 0xa3f   :  { %v1761_v29 = vadd.f32 %v1758_v38, %v1757_v39  ;;  %v1760_v30 = vadd.f32 %v1755_v44, %v3538_v50 }
 0xa41   :  { %1762 = vadd.xlane.f32.xlu0 %v1761_v29 }
 0xa42   :  { %v1712_v45 = vpop.f32.mrf.mxu2 }
 0xa43   :  { %v1727_v46 = vadd.f32 %v1726_v40, %v1712_v45 }
 0xa45   :  { %v1759_v49 = vadd.f32 %v1727_v46, %v3532_v16 }
 0xa47   :  { %v1764_v54 = vadd.f32 %v1760_v30, %v1759_v49 }
 0xa49   :  { %1765 = vadd.xlane.f32.xlu0 %v1764_v54 }
 0xab4   :  { %v1763_v41 = vpop.xlane.xlu0 %1762 }
 0xab5   :  { %v1767_v55 = vmul.f32 %v1763_v41, %v3159_v24 }
 0xab7   :  { %v1769_v47 = vsub.f32 %v1757_v39, %v1767_v55  ;;  %v1770_v56 = vsub.f32 %v1758_v38, %v1767_v55 }
 0xab9   :  { %v1773_v53 = vmul.f32 %v1769_v47, %v1769_v47  ;;  %v1774_v57 = vmul.f32 %v1770_v56, %v1770_v56 }
 0xabb   :  { %v1777_v58 = vadd.f32 %v1774_v57, %v1773_v53 }
 0xabc   :  { %v1766_v59 = vpop.xlane.xlu0 %1765 }
 0xabd   :  { %v1768_v60 = vmul.f32 %v1766_v59, %v3159_v24  ;;  %1778 = vadd.xlane.f32.xlu0 %v1777_v58 }
 0xabf   :  { %v1771_v61 = vsub.f32 %v1759_v49, %v1768_v60  ;;  %v1772_v62 = vsub.f32 %v1760_v30, %v1768_v60 }
 0xac1   :  { %v1775_v63 = vmul.f32 %v1771_v61, %v1771_v61  ;;  %v1776_v50 = vmul.f32 %v1772_v62, %v1772_v62 }
 0xac3   :  { %v1780_v0 = vadd.f32 %v1776_v50, %v1775_v63 }
 0xac5   :  { %1781 = vadd.xlane.f32.xlu0 %v1780_v0 }
 0xb30   :  { %v1779_v16 = vpop.xlane.xlu0 %1778 }
 0xb31   :  { %v1783_v1 = vmul.f32 %v1779_v16, %v3159_v24 }
 0xb33   :  { %v1785_v2 = vadd.f32 1e-05, %v1783_v1 }
 0xb35   :  { %2618 = vrsqrt.f32 %v1785_v2  ;;  %vm1793_vm6 = vweird.f32 %v1785_v2 }
 0xb38   :  { %v1782_v3 = vpop.xlane.xlu0 %1781 }
 0xb39   :  { %v1784_v4 = vmul.f32 %v1782_v3, %v3159_v24 }
 0xb3b   :  { %v2619_v5 = vpop.eup %2618  ;;  %v1786_v6 = vadd.f32 1e-05, %v1784_v4 }
 0xb3c   :  { %v1788_v7 = vmul.f32 %v2619_v5, %v1785_v2  ;;  %vm1794_vm5 = vweird.f32 %v2619_v5 }
 0xb3d   :  { %2620 = vrsqrt.f32 %v1786_v6  ;;  %vm1795_vm7 = vmor %vm1793_vm6, %vm1794_vm5  ;;  %vm1803_vm9 = vweird.f32 %v1786_v6 }
 0xb3e   :  { %v1789_v8 = vmul.f32 %v2619_v5, %v1788_v7 }
 0xb40   :  { %v1790_v9 = vmul.f32 0.5, %v1789_v8 }
 0xb42   :  { %v1791_v10 = vsub.f32 1.5, %v1790_v9 }
 0xb43   :  { %v2621_v11 = vpop.eup %2620 }
 0xb44   :  { %v1792_v12 = vmul.f32 %v2619_v5, %v1791_v10  ;;  %v1798_v13 = vmul.f32 %v2621_v11, %v1786_v6  ;;  %vm1804_vm8 = vweird.f32 %v2621_v11 }
 0xb45   :  { %vm1805_vm10 = vmor %vm1803_vm9, %vm1804_vm8 }
 0xb46   :  { %v1796_v14 = vsel %vm1795_vm7, %v2619_v5, %v1792_v12  ;;  %v1799_v52 = vmul.f32 %v2621_v11, %v1798_v13 }
 0xb47   :  { %v1807_v15 = vmul.f32 %v1796_v14, %v1769_v47  ;;  %v1808_v17 = vmul.f32 %v1796_v14, %v1770_v56 }
 0xb48   :  { %v1800_v21 = vmul.f32 0.5, %v1799_v52 }
 0xb49   :  { %1811 = vst [vmem:[#allocation13] sm:$0xff] %v1807_v15 }
 0xb4a   :  { %1812 = vst [vmem:[#allocation13 + $0x8] sm:$0xff] %v1808_v17  ;;  %v1801_v24 = vsub.f32 1.5, %v1800_v21 }
 0xb4c   :  { %v1802_v48 = vmul.f32 %v2621_v11, %v1801_v24 }
 0xb4e   :  { %v1806_v37 = vsel %vm1805_vm10, %v2621_v11, %v1802_v48 }
 0xb4f   :  { %v1809_v51 = vmul.f32 %v1806_v37, %v1771_v61  ;;  %v1810_v18 = vmul.f32 %v1806_v37, %v1772_v62 }
 0xb51   :  { %1813 = vst [vmem:[#allocation13 + $0x10] sm:$0xff] %v1809_v51 }
 0xb52   :  { %1814 = vst [vmem:[#allocation13 + $0x18] sm:$0xff] %v1810_v18 }
 0xb53   :  { %1827 = dma.vmem_to_hbm [thread:$0]  %s1820_s27, 512, %s1822_s2, [#allocation4], %s2807_s18, %s2807_s18, %s2808_s19  }
 0xb54   :  { %2798 = dma.done.wait [#allocation4], 512  }
 0xb55   :  { %2799 = vsyncadd [#allocation4], 4294966784 }
 0xb56   :  { %1832 = vsyncpa [#allocation3], 1 }
 0xb57   :  { %1833 = vsyncpa [#allocation6], 1 }
 0xb58   :  { %1834 = vsyncpa [#allocation9], 1 }
 0xb59   :  { %1835 = vsyncpa [#allocation12], 1 }
 0xb5a   :  { %1836 = vsyncpa [#allocation4], 1 }

</bundles_post_ra>
